<compile_context>
chip_gen: v5e
topology: v5e:2x2
jax: 0.10.0
libtpu: 0.0.40
codegen_flags: <defaults>
</compile_context>

<pallas_src>
import functools

import jax
import jax.numpy as jnp
from jax.experimental import pallas as pl
from jax.experimental.pallas import tpu as pltpu


def _round_up(x, m):
    return (x + m - 1) // m * m


# ---------------------------------------------------------------------------
# Fused BasicBlock kernel (one grid step == one image)
# ---------------------------------------------------------------------------

def _basic_block_kernel(xph_ref, w1_ref, b1_ref, w2_ref, b2_ref, ws_ref, bs_ref,
                        o_ref, y1_ref, *, stride, ho, wo, cin_p, pp, dot_dtype):
    s = stride
    m = ho * wo
    f32 = jnp.float32

    def x_tap(di, dj):
        # conv1 tap (di, dj): contiguous slice of the phase-decomposed input.
        p, o = di % s, di // s
        q, u = dj % s, dj // s
        xs = xph_ref[0, p, q, pl.ds(o, ho), pl.ds(u, wo), :]
        return xs.reshape(m, cin_p).astype(dot_dtype)

    # ---- conv1 (3x3, stride s) + bn1 + relu: 9 shifted-slice MXU dots -----
    acc1 = jnp.zeros((m, pp), f32)
    for t in range(9):
        di, dj = divmod(t, 3)
        acc1 += jnp.dot(x_tap(di, dj), w1_ref[t].astype(dot_dtype),
                        preferred_element_type=f32)
    y1 = jnp.maximum(acc1 + b1_ref[...], 0.0)

    # stage out1 in a zero-haloed VMEM scratch so conv2 (pad=1) is pure slicing
    y1_ref[...] = jnp.zeros_like(y1_ref)
    y1_ref[pl.ds(1, ho), pl.ds(1, wo), :] = y1.reshape(ho, wo, pp)

    # ---- conv2 (3x3, stride 1) + bn2 ---------------------------------------
    acc2 = jnp.zeros((m, pp), f32)
    for t in range(9):
        di, dj = divmod(t, 3)
        ys = y1_ref[pl.ds(di, ho), pl.ds(dj, wo), :].reshape(m, pp)
        acc2 += jnp.dot(ys.astype(dot_dtype), w2_ref[t].astype(dot_dtype),
                        preferred_element_type=f32)

    # ---- shortcut: 1x1 stride-s conv (+bn) fused in; identity uses an
    #      identity weight matrix so the code path is uniform ----------------
    p0, o0 = 1 % s, 1 // s
    xs0 = xph_ref[0, p0, p0, pl.ds(o0, ho), pl.ds(o0, wo), :]
    acc2 += jnp.dot(xs0.reshape(m, cin_p).astype(dot_dtype),
                    ws_ref[...].astype(dot_dtype), preferred_element_type=f32)

    # ---- epilogue: + biases, relu, lane-dense (128) store ------------------
    y = jnp.maximum(acc2 + b2_ref[...] + bs_ref[...], 0.0)
    o_ref[...] = y.reshape(1, ho, wo, pp).astype(o_ref.dtype)


# ---------------------------------------------------------------------------
# Host wrapper: BN folding, channel/phase padding, pallas_call
# ---------------------------------------------------------------------------

def basic_block_forward(x_nchw, params, stride, *, mxu_dtype=jnp.float32):
    """ResNet BasicBlock forward (inference-mode BN). NCHW in / NCHW out."""
    s = int(stride)
    # NCHW -> NHWC (TODO(synk): in a full network keep activations NHWC
    # end-to-end and hoist this transpose out of the per-block wrapper).
    x = jnp.transpose(x_nchw, (0, 2, 3, 1)).astype(jnp.float32)
    n, h, w, cin = x.shape
    planes = params["conv1_w"].shape[0]

    ho = (h + 2 - 3) // s + 1
    wo = (w + 2 - 3) // s + 1
    hh = ho + 2 // s                 # per-phase rows needed by a 3x3 kernel
    wh = wo + 2 // s
    cin_p = _round_up(cin, 8)        # sublane-friendly contraction dim
    pp = _round_up(planes, 128)      # lane-dense output channels

    # --- host-side prep: O(input) bytes, no im2col blowup -------------------
    # conv padding (1) + extra bottom/right zeros so each stride-phase is
    # exactly (hh, wh); channels zero-padded to cin_p.
    x_pad = jnp.pad(x, ((0, 0), (1, s * hh - h - 1), (1, s * wh - w - 1),
                        (0, cin_p - cin)))
    phases = [x_pad[:, p::s, q::s, :] for p in range(s) for q in range(s)]
    xph = jnp.stack(phases, axis=1).reshape(n, s, s, hh, wh, cin_p)

    def fold(w_oihw, gamma, beta, mean, var, cin_pad, eps=1e-5):
        scale = gamma / jnp.sqrt(var + eps)
        bias = beta - mean * scale
        cout, cin_w, kh, kw = w_oihw.shape
        # OIHW -> (kh*kw, cin_pad, pp), BN scale folded into the columns.
        wm = jnp.transpose(w_oihw, (2, 3, 1, 0)).reshape(kh * kw, cin_w, cout)
        wm = wm * scale[None, None, :]
        wm = jnp.pad(wm, ((0, 0), (0, cin_pad - cin_w), (0, pp - cout)))
        bias = jnp.pad(bias, (0, pp - cout)).reshape(1, pp)
        return wm.astype(jnp.float32), bias.astype(jnp.float32)

    w1, b1 = fold(params["conv1_w"], params["bn1_gamma"], params["bn1_beta"],
                  params["bn1_mean"], params["bn1_var"], cin_p)
    w2, b2 = fold(params["conv2_w"], params["bn2_gamma"], params["bn2_beta"],
                  params["bn2_mean"], params["bn2_var"], pp)
    if s != 1 or cin != planes:
        ws3, bs = fold(params["sc_w"], params["sc_gamma"], params["sc_beta"],
                       params["sc_mean"], params["sc_var"], cin_p)
        ws = ws3[0]                                      # 1x1 -> (cin_p, pp)
    else:
        ws = jnp.eye(cin_p, pp, dtype=jnp.float32)       # identity shortcut
        bs = jnp.zeros((1, pp), jnp.float32)

    if mxu_dtype != jnp.float32:                         # optional bf16 inputs
        xph, w1, w2, ws = (a.astype(mxu_dtype) for a in (xph, w1, w2, ws))

    kernel = functools.partial(
        _basic_block_kernel, stride=s, ho=ho, wo=wo, cin_p=cin_p, pp=pp,
        dot_dtype=mxu_dtype)

    m = ho * wo
    flops = 2 * n * m * (9 * cin_p * pp + 9 * pp * pp + cin_p * pp)
    bytes_accessed = (sum(a.size * a.dtype.itemsize
                          for a in (xph, w1, b1, w2, b2, ws, bs))
                      + n * m * pp * 4)

    out = pl.pallas_call(
        kernel,
        out_shape=jax.ShapeDtypeStruct((n, ho, wo, pp), jnp.float32),
        grid=(n,),
        in_specs=[
            pl.BlockSpec((1, s, s, hh, wh, cin_p),
                         lambda i: (i, 0, 0, 0, 0, 0)),        # input phases
            pl.BlockSpec((9, cin_p, pp), lambda i: (0, 0, 0)),  # conv1 * bn1
            pl.BlockSpec((1, pp), lambda i: (0, 0)),            # bn1 bias
            pl.BlockSpec((9, pp, pp), lambda i: (0, 0, 0)),     # conv2 * bn2
            pl.BlockSpec((1, pp), lambda i: (0, 0)),            # bn2 bias
            pl.BlockSpec((cin_p, pp), lambda i: (0, 0)),        # shortcut w
            pl.BlockSpec((1, pp), lambda i: (0, 0)),            # shortcut bias
        ],
        out_specs=pl.BlockSpec((1, ho, wo, pp), lambda i: (i, 0, 0, 0)),
        scratch_shapes=[pltpu.VMEM((ho + 2, wo + 2, pp), jnp.float32)],
        compiler_params=pltpu.CompilerParams(
            dimension_semantics=("parallel",)),
        cost_estimate=pl.CostEstimate(flops=flops, transcendentals=0,
                                      bytes_accessed=bytes_accessed),
    )(xph, w1, b1, w2, b2, ws, bs)

    out = out[:, :, :, :planes]                     # drop channel padding
    return jnp.transpose(out, (0, 3, 1, 2))         # back to NCHW


# ---------------------------------------------------------------------------
# Pure-JAX reference (correctness check)
# ---------------------------------------------------------------------------

def _ref_conv(x, w, stride, pad):
    return jax.lax.conv_general_dilated(
        x, w, (stride, stride), [(pad, pad), (pad, pad)],
        dimension_numbers=("NCHW", "OIHW", "NCHW"))


def _ref_bn(x, g, b, m, v, eps=1e-5):
    g, b, m, v = (a[None, :, None, None] for a in (g, b, m, v))
    return (x - m) / jnp.sqrt(v + eps) * g + b


def ref_forward(x, params, stride):
    out = jax.nn.relu(_ref_bn(_ref_conv(x, params["conv1_w"], stride, 1),
                              params["bn1_gamma"], params["bn1_beta"],
                              params["bn1_mean"], params["bn1_var"]))
    out = _ref_bn(_ref_conv(out, params["conv2_w"], 1, 1),
                  params["bn2_gamma"], params["bn2_beta"],
                  params["bn2_mean"], params["bn2_var"])
    cin, planes = x.shape[1], params["conv1_w"].shape[0]
    if stride != 1 or cin != planes:
        sc = _ref_bn(_ref_conv(x, params["sc_w"], stride, 0),
                     params["sc_gamma"], params["sc_beta"],
                     params["sc_mean"], params["sc_var"])
    else:
        sc = x
    return jax.nn.relu(out + sc)


# ---------------------------------------------------------------------------
# Main
# ---------------------------------------------------------------------------

def _make_params(key, in_planes, planes, with_shortcut):
    ks = jax.random.split(key, 16)
    p = {
        "conv1_w": 0.1 * jax.random.normal(ks[1], (planes, in_planes, 3, 3), jnp.float32),
        "bn1_gamma": 1.0 + 0.1 * jax.random.normal(ks[2], (planes,), jnp.float32),
        "bn1_beta": 0.1 * jax.random.normal(ks[3], (planes,), jnp.float32),
        "bn1_mean": 0.1 * jax.random.normal(ks[4], (planes,), jnp.float32),
        "bn1_var": 0.5 + jnp.abs(jax.random.normal(ks[5], (planes,), jnp.float32)),
        "conv2_w": 0.1 * jax.random.normal(ks[6], (planes, planes, 3, 3), jnp.float32),
        "bn2_gamma": 1.0 + 0.1 * jax.random.normal(ks[7], (planes,), jnp.float32),
        "bn2_beta": 0.1 * jax.random.normal(ks[8], (planes,), jnp.float32),
        "bn2_mean": 0.1 * jax.random.normal(ks[9], (planes,), jnp.float32),
        "bn2_var": 0.5 + jnp.abs(jax.random.normal(ks[10], (planes,), jnp.float32)),
    }
    if with_shortcut:
        p.update({
            "sc_w": 0.1 * jax.random.normal(ks[11], (planes, in_planes, 1, 1), jnp.float32),
            "sc_gamma": 1.0 + 0.1 * jax.random.normal(ks[12], (planes,), jnp.float32),
            "sc_beta": 0.1 * jax.random.normal(ks[13], (planes,), jnp.float32),
            "sc_mean": 0.1 * jax.random.normal(ks[14], (planes,), jnp.float32),
            "sc_var": 0.5 + jnp.abs(jax.random.normal(ks[15], (planes,), jnp.float32)),
        })
    return p


if __name__ == "__main__":
    key = jax.random.PRNGKey(0)
    k_x1, k_p1, k_x2, k_p2 = jax.random.split(key, 4)

    # Case 1: stride=2 downsampling block with 1x1 projection shortcut.
    n, in_planes, planes, h, w, stride = 2, 4, 8, 16, 16, 2
    x1 = jax.random.normal(k_x1, (n, in_planes, h, w), jnp.float32)
    p1 = _make_params(k_p1, in_planes, planes, with_shortcut=True)
    out1 = jax.block_until_ready(basic_block_forward(x1, p1, stride))
    ref1 = jax.block_until_ready(ref_forward(x1, p1, stride))
    assert out1.shape == (n, planes, h // stride, w // stride), out1.shape
    assert jnp.allclose(out1, ref1, atol=1e-4, rtol=1e-4), \
        float(jnp.max(jnp.abs(out1 - ref1)))

    # Case 2: stride=1 block with identity shortcut.
    x2 = jax.random.normal(k_x2, (n, planes, h, w), jnp.float32)
    p2 = _make_params(k_p2, planes, planes, with_shortcut=False)
    out2 = jax.block_until_ready(basic_block_forward(x2, p2, 1))
    ref2 = jax.block_until_ready(ref_forward(x2, p2, 1))
    assert out2.shape == (n, planes, h, w), out2.shape
    assert jnp.allclose(out2, ref2, atol=1e-4, rtol=1e-4), \
        float(jnp.max(jnp.abs(out2 - ref2)))

    print("KERNEL_OK")
</pallas_src>

<mosaic_0001>
module attributes {stable_mosaic.version = 11 : i64} {
  func.func @_basic_block_kernel(%arg0: i32, %arg1: memref<1x2x2x9x9x8xf32, #tpu.memory_space<vmem>>, %arg2: memref<9x8x128xf32, #tpu.memory_space<vmem>>, %arg3: memref<1x128xf32, #tpu.memory_space<vmem>>, %arg4: memref<9x128x128xf32, #tpu.memory_space<vmem>>, %arg5: memref<1x128xf32, #tpu.memory_space<vmem>>, %arg6: memref<8x128xf32, #tpu.memory_space<vmem>>, %arg7: memref<1x128xf32, #tpu.memory_space<vmem>>, %arg8: memref<1x8x8x128xf32, #tpu.memory_space<vmem>>, %arg9: memref<10x10x128xf32, #tpu.memory_space<vmem>>) attributes {dimension_semantics = [#tpu.dimension_semantics<parallel>], iteration_bounds = array<i64: 2>, scalar_prefetch = 0 : i64, scratch_operands = 1 : i64, tpu.core_type = #tpu.core_type<tc>, window_params = [{transform_indices = @transform_0, window_bounds = array<i64: 1, 2, 2, 9, 9, 8>}, {pipeline_mode = #tpu.pipeline_mode<synchronous>, transform_indices = @transform_1, window_bounds = array<i64: 9, 8, 128>}, {pipeline_mode = #tpu.pipeline_mode<synchronous>, transform_indices = @transform_2, window_bounds = array<i64: 1, 128>}, {pipeline_mode = #tpu.pipeline_mode<synchronous>, transform_indices = @transform_3, window_bounds = array<i64: 9, 128, 128>}, {pipeline_mode = #tpu.pipeline_mode<synchronous>, transform_indices = @transform_4, window_bounds = array<i64: 1, 128>}, {pipeline_mode = #tpu.pipeline_mode<synchronous>, transform_indices = @transform_5, window_bounds = array<i64: 8, 128>}, {pipeline_mode = #tpu.pipeline_mode<synchronous>, transform_indices = @transform_6, window_bounds = array<i64: 1, 128>}, {transform_indices = @transform_7, window_bounds = array<i64: 1, 8, 8, 128>}]} {
    %cst = arith.constant 0.000000e+00 : f32
    %0 = vector.broadcast %cst : f32 to vector<64x128xf32>
    %c0 = arith.constant 0 : index
    %c0_0 = arith.constant 0 : index
    %c0_1 = arith.constant 0 : index
    %c0_2 = arith.constant 0 : index
    %c0_3 = arith.constant 0 : index
    %c0_4 = arith.constant 0 : index
    %1 = vector.load %arg1[%c0, %c0_0, %c0_1, %c0_2, %c0_3, %c0_4] : memref<1x2x2x9x9x8xf32, #tpu.memory_space<vmem>>, vector<1x1x1x8x8x8xf32>
    %2 = vector.shape_cast %1 : vector<1x1x1x8x8x8xf32> to vector<8x8x8xf32>
    %3 = vector.shape_cast %2 : vector<8x8x8xf32> to vector<64x8xf32>
    %c0_5 = arith.constant 0 : index
    %c0_6 = arith.constant 0 : index
    %c0_7 = arith.constant 0 : index
    %4 = vector.load %arg2[%c0_5, %c0_6, %c0_7] : memref<9x8x128xf32, #tpu.memory_space<vmem>>, vector<1x8x128xf32>
    %5 = vector.shape_cast %4 : vector<1x8x128xf32> to vector<8x128xf32>
    %cst_8 = arith.constant dense<0.000000e+00> : vector<64x128xf32>
    %6 = tpu.matmul %3, %5, %cst_8 {dimension_numbers = #tpu.dot_dimension_numbers<[1], [0], [0], [1], [0, 0, 1, 1], [], []>} : vector<64x8xf32>, vector<8x128xf32>, vector<64x128xf32> -> vector<64x128xf32>
    %7 = arith.addf %0, %6 : vector<64x128xf32>
    %c0_9 = arith.constant 0 : index
    %c0_10 = arith.constant 0 : index
    %c1 = arith.constant 1 : index
    %c0_11 = arith.constant 0 : index
    %c0_12 = arith.constant 0 : index
    %c0_13 = arith.constant 0 : index
    %8 = vector.load %arg1[%c0_9, %c0_10, %c1, %c0_11, %c0_12, %c0_13] : memref<1x2x2x9x9x8xf32, #tpu.memory_space<vmem>>, vector<1x1x1x8x8x8xf32>
    %9 = vector.shape_cast %8 : vector<1x1x1x8x8x8xf32> to vector<8x8x8xf32>
    %10 = vector.shape_cast %9 : vector<8x8x8xf32> to vector<64x8xf32>
    %c1_14 = arith.constant 1 : index
    %c0_15 = arith.constant 0 : index
    %c0_16 = arith.constant 0 : index
    %11 = vector.load %arg2[%c1_14, %c0_15, %c0_16] : memref<9x8x128xf32, #tpu.memory_space<vmem>>, vector<1x8x128xf32>
    %12 = vector.shape_cast %11 : vector<1x8x128xf32> to vector<8x128xf32>
    %cst_17 = arith.constant dense<0.000000e+00> : vector<64x128xf32>
    %13 = tpu.matmul %10, %12, %cst_17 {dimension_numbers = #tpu.dot_dimension_numbers<[1], [0], [0], [1], [0, 0, 1, 1], [], []>} : vector<64x8xf32>, vector<8x128xf32>, vector<64x128xf32> -> vector<64x128xf32>
    %14 = arith.addf %7, %13 : vector<64x128xf32>
    %c0_18 = arith.constant 0 : index
    %c0_19 = arith.constant 0 : index
    %c0_20 = arith.constant 0 : index
    %c0_21 = arith.constant 0 : index
    %c1_22 = arith.constant 1 : index
    %c0_23 = arith.constant 0 : index
    %15 = vector.load %arg1[%c0_18, %c0_19, %c0_20, %c0_21, %c1_22, %c0_23] : memref<1x2x2x9x9x8xf32, #tpu.memory_space<vmem>>, vector<1x1x1x8x8x8xf32>
    %16 = vector.shape_cast %15 : vector<1x1x1x8x8x8xf32> to vector<8x8x8xf32>
    %17 = vector.shape_cast %16 : vector<8x8x8xf32> to vector<64x8xf32>
    %c2 = arith.constant 2 : index
    %c0_24 = arith.constant 0 : index
    %c0_25 = arith.constant 0 : index
    %18 = vector.load %arg2[%c2, %c0_24, %c0_25] : memref<9x8x128xf32, #tpu.memory_space<vmem>>, vector<1x8x128xf32>
    %19 = vector.shape_cast %18 : vector<1x8x128xf32> to vector<8x128xf32>
    %cst_26 = arith.constant dense<0.000000e+00> : vector<64x128xf32>
    %20 = tpu.matmul %17, %19, %cst_26 {dimension_numbers = #tpu.dot_dimension_numbers<[1], [0], [0], [1], [0, 0, 1, 1], [], []>} : vector<64x8xf32>, vector<8x128xf32>, vector<64x128xf32> -> vector<64x128xf32>
    %21 = arith.addf %14, %20 : vector<64x128xf32>
    %c0_27 = arith.constant 0 : index
    %c1_28 = arith.constant 1 : index
    %c0_29 = arith.constant 0 : index
    %c0_30 = arith.constant 0 : index
    %c0_31 = arith.constant 0 : index
    %c0_32 = arith.constant 0 : index
    %22 = vector.load %arg1[%c0_27, %c1_28, %c0_29, %c0_30, %c0_31, %c0_32] : memref<1x2x2x9x9x8xf32, #tpu.memory_space<vmem>>, vector<1x1x1x8x8x8xf32>
    %23 = vector.shape_cast %22 : vector<1x1x1x8x8x8xf32> to vector<8x8x8xf32>
    %24 = vector.shape_cast %23 : vector<8x8x8xf32> to vector<64x8xf32>
    %c3 = arith.constant 3 : index
    %c0_33 = arith.constant 0 : index
    %c0_34 = arith.constant 0 : index
    %25 = vector.load %arg2[%c3, %c0_33, %c0_34] : memref<9x8x128xf32, #tpu.memory_space<vmem>>, vector<1x8x128xf32>
    %26 = vector.shape_cast %25 : vector<1x8x128xf32> to vector<8x128xf32>
    %cst_35 = arith.constant dense<0.000000e+00> : vector<64x128xf32>
    %27 = tpu.matmul %24, %26, %cst_35 {dimension_numbers = #tpu.dot_dimension_numbers<[1], [0], [0], [1], [0, 0, 1, 1], [], []>} : vector<64x8xf32>, vector<8x128xf32>, vector<64x128xf32> -> vector<64x128xf32>
    %28 = arith.addf %21, %27 : vector<64x128xf32>
    %c0_36 = arith.constant 0 : index
    %c1_37 = arith.constant 1 : index
    %c1_38 = arith.constant 1 : index
    %c0_39 = arith.constant 0 : index
    %c0_40 = arith.constant 0 : index
    %c0_41 = arith.constant 0 : index
    %29 = vector.load %arg1[%c0_36, %c1_37, %c1_38, %c0_39, %c0_40, %c0_41] : memref<1x2x2x9x9x8xf32, #tpu.memory_space<vmem>>, vector<1x1x1x8x8x8xf32>
    %30 = vector.shape_cast %29 : vector<1x1x1x8x8x8xf32> to vector<8x8x8xf32>
    %31 = vector.shape_cast %30 : vector<8x8x8xf32> to vector<64x8xf32>
    %c4 = arith.constant 4 : index
    %c0_42 = arith.constant 0 : index
    %c0_43 = arith.constant 0 : index
    %32 = vector.load %arg2[%c4, %c0_42, %c0_43] : memref<9x8x128xf32, #tpu.memory_space<vmem>>, vector<1x8x128xf32>
    %33 = vector.shape_cast %32 : vector<1x8x128xf32> to vector<8x128xf32>
    %cst_44 = arith.constant dense<0.000000e+00> : vector<64x128xf32>
    %34 = tpu.matmul %31, %33, %cst_44 {dimension_numbers = #tpu.dot_dimension_numbers<[1], [0], [0], [1], [0, 0, 1, 1], [], []>} : vector<64x8xf32>, vector<8x128xf32>, vector<64x128xf32> -> vector<64x128xf32>
    %35 = arith.addf %28, %34 : vector<64x128xf32>
    %c0_45 = arith.constant 0 : index
    %c1_46 = arith.constant 1 : index
    %c0_47 = arith.constant 0 : index
    %c0_48 = arith.constant 0 : index
    %c1_49 = arith.constant 1 : index
    %c0_50 = arith.constant 0 : index
    %36 = vector.load %arg1[%c0_45, %c1_46, %c0_47, %c0_48, %c1_49, %c0_50] : memref<1x2x2x9x9x8xf32, #tpu.memory_space<vmem>>, vector<1x1x1x8x8x8xf32>
    %37 = vector.shape_cast %36 : vector<1x1x1x8x8x8xf32> to vector<8x8x8xf32>
    %38 = vector.shape_cast %37 : vector<8x8x8xf32> to vector<64x8xf32>
    %c5 = arith.constant 5 : index
    %c0_51 = arith.constant 0 : index
    %c0_52 = arith.constant 0 : index
    %39 = vector.load %arg2[%c5, %c0_51, %c0_52] : memref<9x8x128xf32, #tpu.memory_space<vmem>>, vector<1x8x128xf32>
    %40 = vector.shape_cast %39 : vector<1x8x128xf32> to vector<8x128xf32>
    %cst_53 = arith.constant dense<0.000000e+00> : vector<64x128xf32>
    %41 = tpu.matmul %38, %40, %cst_53 {dimension_numbers = #tpu.dot_dimension_numbers<[1], [0], [0], [1], [0, 0, 1, 1], [], []>} : vector<64x8xf32>, vector<8x128xf32>, vector<64x128xf32> -> vector<64x128xf32>
    %42 = arith.addf %35, %41 : vector<64x128xf32>
    %c0_54 = arith.constant 0 : index
    %c0_55 = arith.constant 0 : index
    %c0_56 = arith.constant 0 : index
    %c1_57 = arith.constant 1 : index
    %c0_58 = arith.constant 0 : index
    %c0_59 = arith.constant 0 : index
    %43 = vector.load %arg1[%c0_54, %c0_55, %c0_56, %c1_57, %c0_58, %c0_59] : memref<1x2x2x9x9x8xf32, #tpu.memory_space<vmem>>, vector<1x1x1x8x8x8xf32>
    %44 = vector.shape_cast %43 : vector<1x1x1x8x8x8xf32> to vector<8x8x8xf32>
    %45 = vector.shape_cast %44 : vector<8x8x8xf32> to vector<64x8xf32>
    %c6 = arith.constant 6 : index
    %c0_60 = arith.constant 0 : index
    %c0_61 = arith.constant 0 : index
    %46 = vector.load %arg2[%c6, %c0_60, %c0_61] : memref<9x8x128xf32, #tpu.memory_space<vmem>>, vector<1x8x128xf32>
    %47 = vector.shape_cast %46 : vector<1x8x128xf32> to vector<8x128xf32>
    %cst_62 = arith.constant dense<0.000000e+00> : vector<64x128xf32>
    %48 = tpu.matmul %45, %47, %cst_62 {dimension_numbers = #tpu.dot_dimension_numbers<[1], [0], [0], [1], [0, 0, 1, 1], [], []>} : vector<64x8xf32>, vector<8x128xf32>, vector<64x128xf32> -> vector<64x128xf32>
    %49 = arith.addf %42, %48 : vector<64x128xf32>
    %c0_63 = arith.constant 0 : index
    %c0_64 = arith.constant 0 : index
    %c1_65 = arith.constant 1 : index
    %c1_66 = arith.constant 1 : index
    %c0_67 = arith.constant 0 : index
    %c0_68 = arith.constant 0 : index
    %50 = vector.load %arg1[%c0_63, %c0_64, %c1_65, %c1_66, %c0_67, %c0_68] : memref<1x2x2x9x9x8xf32, #tpu.memory_space<vmem>>, vector<1x1x1x8x8x8xf32>
    %51 = vector.shape_cast %50 : vector<1x1x1x8x8x8xf32> to vector<8x8x8xf32>
    %52 = vector.shape_cast %51 : vector<8x8x8xf32> to vector<64x8xf32>
    %c7 = arith.constant 7 : index
    %c0_69 = arith.constant 0 : index
    %c0_70 = arith.constant 0 : index
    %53 = vector.load %arg2[%c7, %c0_69, %c0_70] : memref<9x8x128xf32, #tpu.memory_space<vmem>>, vector<1x8x128xf32>
    %54 = vector.shape_cast %53 : vector<1x8x128xf32> to vector<8x128xf32>
    %cst_71 = arith.constant dense<0.000000e+00> : vector<64x128xf32>
    %55 = tpu.matmul %52, %54, %cst_71 {dimension_numbers = #tpu.dot_dimension_numbers<[1], [0], [0], [1], [0, 0, 1, 1], [], []>} : vector<64x8xf32>, vector<8x128xf32>, vector<64x128xf32> -> vector<64x128xf32>
    %56 = arith.addf %49, %55 : vector<64x128xf32>
    %c0_72 = arith.constant 0 : index
    %c0_73 = arith.constant 0 : index
    %c0_74 = arith.constant 0 : index
    %c1_75 = arith.constant 1 : index
    %c1_76 = arith.constant 1 : index
    %c0_77 = arith.constant 0 : index
    %57 = vector.load %arg1[%c0_72, %c0_73, %c0_74, %c1_75, %c1_76, %c0_77] : memref<1x2x2x9x9x8xf32, #tpu.memory_space<vmem>>, vector<1x1x1x8x8x8xf32>
    %58 = vector.shape_cast %57 : vector<1x1x1x8x8x8xf32> to vector<8x8x8xf32>
    %59 = vector.shape_cast %58 : vector<8x8x8xf32> to vector<64x8xf32>
    %c8 = arith.constant 8 : index
    %c0_78 = arith.constant 0 : index
    %c0_79 = arith.constant 0 : index
    %60 = vector.load %arg2[%c8, %c0_78, %c0_79] : memref<9x8x128xf32, #tpu.memory_space<vmem>>, vector<1x8x128xf32>
    %61 = vector.shape_cast %60 : vector<1x8x128xf32> to vector<8x128xf32>
    %cst_80 = arith.constant dense<0.000000e+00> : vector<64x128xf32>
    %62 = tpu.matmul %59, %61, %cst_80 {dimension_numbers = #tpu.dot_dimension_numbers<[1], [0], [0], [1], [0, 0, 1, 1], [], []>} : vector<64x8xf32>, vector<8x128xf32>, vector<64x128xf32> -> vector<64x128xf32>
    %63 = arith.addf %56, %62 : vector<64x128xf32>
    %c0_81 = arith.constant 0 : index
    %c0_82 = arith.constant 0 : index
    %64 = vector.load %arg3[%c0_81, %c0_82] : memref<1x128xf32, #tpu.memory_space<vmem>>, vector<1x128xf32>
    %65 = vector.broadcast %64 : vector<1x128xf32> to vector<64x128xf32>
    %66 = arith.addf %63, %65 : vector<64x128xf32>
    %cst_83 = arith.constant 0.000000e+00 : f32
    %67 = vector.broadcast %cst_83 : f32 to vector<64x128xf32>
    %68 = arith.maximumf %66, %67 : vector<64x128xf32>
    %cst_84 = arith.constant 0.000000e+00 : f32
    %69 = vector.broadcast %cst_84 : f32 to vector<10x10x128xf32>
    %c0_85 = arith.constant 0 : index
    %c0_86 = arith.constant 0 : index
    %c0_87 = arith.constant 0 : index
    %70 = vector.load %arg9[%c0_85, %c0_86, %c0_87] : memref<10x10x128xf32, #tpu.memory_space<vmem>>, vector<10x10x128xf32>
    tpu.vector_store %arg9[%c0_85, %c0_86, %c0_87], %69 {strides = array<i32>} : memref<10x10x128xf32, #tpu.memory_space<vmem>>, vector<10x10x128xf32>,
    %71 = vector.shape_cast %68 : vector<64x128xf32> to vector<8x8x128xf32>
    %c1_88 = arith.constant 1 : index
    %c1_89 = arith.constant 1 : index
    %c0_90 = arith.constant 0 : index
    %72 = vector.load %arg9[%c1_88, %c1_89, %c0_90] : memref<10x10x128xf32, #tpu.memory_space<vmem>>, vector<8x8x128xf32>
    tpu.vector_store %arg9[%c1_88, %c1_89, %c0_90], %71 {strides = array<i32>} : memref<10x10x128xf32, #tpu.memory_space<vmem>>, vector<8x8x128xf32>,
    %cst_91 = arith.constant 0.000000e+00 : f32
    %73 = vector.broadcast %cst_91 : f32 to vector<64x128xf32>
    %c0_92 = arith.constant 0 : index
    %c0_93 = arith.constant 0 : index
    %c0_94 = arith.constant 0 : index
    %74 = vector.load %arg9[%c0_92, %c0_93, %c0_94] : memref<10x10x128xf32, #tpu.memory_space<vmem>>, vector<8x8x128xf32>
    %75 = vector.shape_cast %74 : vector<8x8x128xf32> to vector<64x128xf32>
    %c0_95 = arith.constant 0 : index
    %c0_96 = arith.constant 0 : index
    %c0_97 = arith.constant 0 : index
    %76 = vector.load %arg4[%c0_95, %c0_96, %c0_97] : memref<9x128x128xf32, #tpu.memory_space<vmem>>, vector<1x128x128xf32>
    %77 = vector.shape_cast %76 : vector<1x128x128xf32> to vector<128x128xf32>
    %cst_98 = arith.constant dense<0.000000e+00> : vector<64x128xf32>
    %78 = tpu.matmul %75, %77, %cst_98 {dimension_numbers = #tpu.dot_dimension_numbers<[1], [0], [0], [1], [0, 0, 1, 1], [], []>} : vector<64x128xf32>, vector<128x128xf32>, vector<64x128xf32> -> vector<64x128xf32>
    %79 = arith.addf %73, %78 : vector<64x128xf32>
    %c0_99 = arith.constant 0 : index
    %c1_100 = arith.constant 1 : index
    %c0_101 = arith.constant 0 : index
    %80 = vector.load %arg9[%c0_99, %c1_100, %c0_101] : memref<10x10x128xf32, #tpu.memory_space<vmem>>, vector<8x8x128xf32>
    %81 = vector.shape_cast %80 : vector<8x8x128xf32> to vector<64x128xf32>
    %c1_102 = arith.constant 1 : index
    %c0_103 = arith.constant 0 : index
    %c0_104 = arith.constant 0 : index
    %82 = vector.load %arg4[%c1_102, %c0_103, %c0_104] : memref<9x128x128xf32, #tpu.memory_space<vmem>>, vector<1x128x128xf32>
    %83 = vector.shape_cast %82 : vector<1x128x128xf32> to vector<128x128xf32>
    %cst_105 = arith.constant dense<0.000000e+00> : vector<64x128xf32>
    %84 = tpu.matmul %81, %83, %cst_105 {dimension_numbers = #tpu.dot_dimension_numbers<[1], [0], [0], [1], [0, 0, 1, 1], [], []>} : vector<64x128xf32>, vector<128x128xf32>, vector<64x128xf32> -> vector<64x128xf32>
    %85 = arith.addf %79, %84 : vector<64x128xf32>
    %c0_106 = arith.constant 0 : index
    %c2_107 = arith.constant 2 : index
    %c0_108 = arith.constant 0 : index
    %86 = vector.load %arg9[%c0_106, %c2_107, %c0_108] : memref<10x10x128xf32, #tpu.memory_space<vmem>>, vector<8x8x128xf32>
    %87 = vector.shape_cast %86 : vector<8x8x128xf32> to vector<64x128xf32>
    %c2_109 = arith.constant 2 : index
    %c0_110 = arith.constant 0 : index
    %c0_111 = arith.constant 0 : index
    %88 = vector.load %arg4[%c2_109, %c0_110, %c0_111] : memref<9x128x128xf32, #tpu.memory_space<vmem>>, vector<1x128x128xf32>
    %89 = vector.shape_cast %88 : vector<1x128x128xf32> to vector<128x128xf32>
    %cst_112 = arith.constant dense<0.000000e+00> : vector<64x128xf32>
    %90 = tpu.matmul %87, %89, %cst_112 {dimension_numbers = #tpu.dot_dimension_numbers<[1], [0], [0], [1], [0, 0, 1, 1], [], []>} : vector<64x128xf32>, vector<128x128xf32>, vector<64x128xf32> -> vector<64x128xf32>
    %91 = arith.addf %85, %90 : vector<64x128xf32>
    %c1_113 = arith.constant 1 : index
    %c0_114 = arith.constant 0 : index
    %c0_115 = arith.constant 0 : index
    %92 = vector.load %arg9[%c1_113, %c0_114, %c0_115] : memref<10x10x128xf32, #tpu.memory_space<vmem>>, vector<8x8x128xf32>
    %93 = vector.shape_cast %92 : vector<8x8x128xf32> to vector<64x128xf32>
    %c3_116 = arith.constant 3 : index
    %c0_117 = arith.constant 0 : index
    %c0_118 = arith.constant 0 : index
    %94 = vector.load %arg4[%c3_116, %c0_117, %c0_118] : memref<9x128x128xf32, #tpu.memory_space<vmem>>, vector<1x128x128xf32>
    %95 = vector.shape_cast %94 : vector<1x128x128xf32> to vector<128x128xf32>
    %cst_119 = arith.constant dense<0.000000e+00> : vector<64x128xf32>
    %96 = tpu.matmul %93, %95, %cst_119 {dimension_numbers = #tpu.dot_dimension_numbers<[1], [0], [0], [1], [0, 0, 1, 1], [], []>} : vector<64x128xf32>, vector<128x128xf32>, vector<64x128xf32> -> vector<64x128xf32>
    %97 = arith.addf %91, %96 : vector<64x128xf32>
    %c1_120 = arith.constant 1 : index
    %c1_121 = arith.constant 1 : index
    %c0_122 = arith.constant 0 : index
    %98 = vector.load %arg9[%c1_120, %c1_121, %c0_122] : memref<10x10x128xf32, #tpu.memory_space<vmem>>, vector<8x8x128xf32>
    %99 = vector.shape_cast %98 : vector<8x8x128xf32> to vector<64x128xf32>
    %c4_123 = arith.constant 4 : index
    %c0_124 = arith.constant 0 : index
    %c0_125 = arith.constant 0 : index
    %100 = vector.load %arg4[%c4_123, %c0_124, %c0_125] : memref<9x128x128xf32, #tpu.memory_space<vmem>>, vector<1x128x128xf32>
    %101 = vector.shape_cast %100 : vector<1x128x128xf32> to vector<128x128xf32>
    %cst_126 = arith.constant dense<0.000000e+00> : vector<64x128xf32>
    %102 = tpu.matmul %99, %101, %cst_126 {dimension_numbers = #tpu.dot_dimension_numbers<[1], [0], [0], [1], [0, 0, 1, 1], [], []>} : vector<64x128xf32>, vector<128x128xf32>, vector<64x128xf32> -> vector<64x128xf32>
    %103 = arith.addf %97, %102 : vector<64x128xf32>
    %c1_127 = arith.constant 1 : index
    %c2_128 = arith.constant 2 : index
    %c0_129 = arith.constant 0 : index
    %104 = vector.load %arg9[%c1_127, %c2_128, %c0_129] : memref<10x10x128xf32, #tpu.memory_space<vmem>>, vector<8x8x128xf32>
    %105 = vector.shape_cast %104 : vector<8x8x128xf32> to vector<64x128xf32>
    %c5_130 = arith.constant 5 : index
    %c0_131 = arith.constant 0 : index
    %c0_132 = arith.constant 0 : index
    %106 = vector.load %arg4[%c5_130, %c0_131, %c0_132] : memref<9x128x128xf32, #tpu.memory_space<vmem>>, vector<1x128x128xf32>
    %107 = vector.shape_cast %106 : vector<1x128x128xf32> to vector<128x128xf32>
    %cst_133 = arith.constant dense<0.000000e+00> : vector<64x128xf32>
    %108 = tpu.matmul %105, %107, %cst_133 {dimension_numbers = #tpu.dot_dimension_numbers<[1], [0], [0], [1], [0, 0, 1, 1], [], []>} : vector<64x128xf32>, vector<128x128xf32>, vector<64x128xf32> -> vector<64x128xf32>
    %109 = arith.addf %103, %108 : vector<64x128xf32>
    %c2_134 = arith.constant 2 : index
    %c0_135 = arith.constant 0 : index
    %c0_136 = arith.constant 0 : index
    %110 = vector.load %arg9[%c2_134, %c0_135, %c0_136] : memref<10x10x128xf32, #tpu.memory_space<vmem>>, vector<8x8x128xf32>
    %111 = vector.shape_cast %110 : vector<8x8x128xf32> to vector<64x128xf32>
    %c6_137 = arith.constant 6 : index
    %c0_138 = arith.constant 0 : index
    %c0_139 = arith.constant 0 : index
    %112 = vector.load %arg4[%c6_137, %c0_138, %c0_139] : memref<9x128x128xf32, #tpu.memory_space<vmem>>, vector<1x128x128xf32>
    %113 = vector.shape_cast %112 : vector<1x128x128xf32> to vector<128x128xf32>
    %cst_140 = arith.constant dense<0.000000e+00> : vector<64x128xf32>
    %114 = tpu.matmul %111, %113, %cst_140 {dimension_numbers = #tpu.dot_dimension_numbers<[1], [0], [0], [1], [0, 0, 1, 1], [], []>} : vector<64x128xf32>, vector<128x128xf32>, vector<64x128xf32> -> vector<64x128xf32>
    %115 = arith.addf %109, %114 : vector<64x128xf32>
    %c2_141 = arith.constant 2 : index
    %c1_142 = arith.constant 1 : index
    %c0_143 = arith.constant 0 : index
    %116 = vector.load %arg9[%c2_141, %c1_142, %c0_143] : memref<10x10x128xf32, #tpu.memory_space<vmem>>, vector<8x8x128xf32>
    %117 = vector.shape_cast %116 : vector<8x8x128xf32> to vector<64x128xf32>
    %c7_144 = arith.constant 7 : index
    %c0_145 = arith.constant 0 : index
    %c0_146 = arith.constant 0 : index
    %118 = vector.load %arg4[%c7_144, %c0_145, %c0_146] : memref<9x128x128xf32, #tpu.memory_space<vmem>>, vector<1x128x128xf32>
    %119 = vector.shape_cast %118 : vector<1x128x128xf32> to vector<128x128xf32>
    %cst_147 = arith.constant dense<0.000000e+00> : vector<64x128xf32>
    %120 = tpu.matmul %117, %119, %cst_147 {dimension_numbers = #tpu.dot_dimension_numbers<[1], [0], [0], [1], [0, 0, 1, 1], [], []>} : vector<64x128xf32>, vector<128x128xf32>, vector<64x128xf32> -> vector<64x128xf32>
    %121 = arith.addf %115, %120 : vector<64x128xf32>
    %c2_148 = arith.constant 2 : index
    %c2_149 = arith.constant 2 : index
    %c0_150 = arith.constant 0 : index
    %122 = vector.load %arg9[%c2_148, %c2_149, %c0_150] : memref<10x10x128xf32, #tpu.memory_space<vmem>>, vector<8x8x128xf32>
    %123 = vector.shape_cast %122 : vector<8x8x128xf32> to vector<64x128xf32>
    %c8_151 = arith.constant 8 : index
    %c0_152 = arith.constant 0 : index
    %c0_153 = arith.constant 0 : index
    %124 = vector.load %arg4[%c8_151, %c0_152, %c0_153] : memref<9x128x128xf32, #tpu.memory_space<vmem>>, vector<1x128x128xf32>
    %125 = vector.shape_cast %124 : vector<1x128x128xf32> to vector<128x128xf32>
    %cst_154 = arith.constant dense<0.000000e+00> : vector<64x128xf32>
    %126 = tpu.matmul %123, %125, %cst_154 {dimension_numbers = #tpu.dot_dimension_numbers<[1], [0], [0], [1], [0, 0, 1, 1], [], []>} : vector<64x128xf32>, vector<128x128xf32>, vector<64x128xf32> -> vector<64x128xf32>
    %127 = arith.addf %121, %126 : vector<64x128xf32>
    %c0_155 = arith.constant 0 : index
    %c1_156 = arith.constant 1 : index
    %c1_157 = arith.constant 1 : index
    %c0_158 = arith.constant 0 : index
    %c0_159 = arith.constant 0 : index
    %c0_160 = arith.constant 0 : index
    %128 = vector.load %arg1[%c0_155, %c1_156, %c1_157, %c0_158, %c0_159, %c0_160] : memref<1x2x2x9x9x8xf32, #tpu.memory_space<vmem>>, vector<1x1x1x8x8x8xf32>
    %129 = vector.shape_cast %128 : vector<1x1x1x8x8x8xf32> to vector<8x8x8xf32>
    %130 = vector.shape_cast %129 : vector<8x8x8xf32> to vector<64x8xf32>
    %c0_161 = arith.constant 0 : index
    %c0_162 = arith.constant 0 : index
    %131 = vector.load %arg6[%c0_161, %c0_162] : memref<8x128xf32, #tpu.memory_space<vmem>>, vector<8x128xf32>
    %cst_163 = arith.constant dense<0.000000e+00> : vector<64x128xf32>
    %132 = tpu.matmul %130, %131, %cst_163 {dimension_numbers = #tpu.dot_dimension_numbers<[1], [0], [0], [1], [0, 0, 1, 1], [], []>} : vector<64x8xf32>, vector<8x128xf32>, vector<64x128xf32> -> vector<64x128xf32>
    %133 = arith.addf %127, %132 : vector<64x128xf32>
    %c0_164 = arith.constant 0 : index
    %c0_165 = arith.constant 0 : index
    %134 = vector.load %arg5[%c0_164, %c0_165] : memref<1x128xf32, #tpu.memory_space<vmem>>, vector<1x128xf32>
    %135 = vector.broadcast %134 : vector<1x128xf32> to vector<64x128xf32>
    %136 = arith.addf %133, %135 : vector<64x128xf32>
    %c0_166 = arith.constant 0 : index
    %c0_167 = arith.constant 0 : index
    %137 = vector.load %arg7[%c0_166, %c0_167] : memref<1x128xf32, #tpu.memory_space<vmem>>, vector<1x128xf32>
    %138 = vector.broadcast %137 : vector<1x128xf32> to vector<64x128xf32>
    %139 = arith.addf %136, %138 : vector<64x128xf32>
    %cst_168 = arith.constant 0.000000e+00 : f32
    %140 = vector.broadcast %cst_168 : f32 to vector<64x128xf32>
    %141 = arith.maximumf %139, %140 : vector<64x128xf32>
    %142 = vector.shape_cast %141 : vector<64x128xf32> to vector<1x8x8x128xf32>
    %c0_169 = arith.constant 0 : index
    %c0_170 = arith.constant 0 : index
    %c0_171 = arith.constant 0 : index
    %c0_172 = arith.constant 0 : index
    %143 = vector.load %arg8[%c0_169, %c0_170, %c0_171, %c0_172] : memref<1x8x8x128xf32, #tpu.memory_space<vmem>>, vector<1x8x8x128xf32>
    tpu.vector_store %arg8[%c0_169, %c0_170, %c0_171, %c0_172], %142 {strides = array<i32>} : memref<1x8x8x128xf32, #tpu.memory_space<vmem>>, vector<1x8x8x128xf32>,
    return
  }
  func.func @transform_0(%arg0: i32) -> (i32, i32, i32, i32, i32, i32) {
    %c0_i32 = arith.constant 0 : i32
    %c0_i32_0 = arith.constant 0 : i32
    %c0_i32_1 = arith.constant 0 : i32
    %c0_i32_2 = arith.constant 0 : i32
    %c0_i32_3 = arith.constant 0 : i32
    %c0_i32_4 = arith.constant 0 : i32
    return %arg0, %c0_i32, %c0_i32_0, %c0_i32_1, %c0_i32_2, %c0_i32_3 : i32, i32, i32, i32, i32, i32
  }
  func.func @transform_1(%arg0: i32) -> (i32, i32, i32) {
    %c0_i32 = arith.constant 0 : i32
    %c0_i32_0 = arith.constant 0 : i32
    %c0_i32_1 = arith.constant 0 : i32
    %c0_i32_2 = arith.constant 0 : i32
    return %c0_i32, %c0_i32_0, %c0_i32_1 : i32, i32, i32
  }
  func.func @transform_2(%arg0: i32) -> (i32, i32) {
    %c0_i32 = arith.constant 0 : i32
    %c0_i32_0 = arith.constant 0 : i32
    %c0_i32_1 = arith.constant 0 : i32
    return %c0_i32, %c0_i32_0 : i32, i32
  }
  func.func @transform_3(%arg0: i32) -> (i32, i32, i32) {
    %c0_i32 = arith.constant 0 : i32
    %c0_i32_0 = arith.constant 0 : i32
    %c0_i32_1 = arith.constant 0 : i32
    %c0_i32_2 = arith.constant 0 : i32
    return %c0_i32, %c0_i32_0, %c0_i32_1 : i32, i32, i32
  }
  func.func @transform_4(%arg0: i32) -> (i32, i32) {
    %c0_i32 = arith.constant 0 : i32
    %c0_i32_0 = arith.constant 0 : i32
    %c0_i32_1 = arith.constant 0 : i32
    return %c0_i32, %c0_i32_0 : i32, i32
  }
  func.func @transform_5(%arg0: i32) -> (i32, i32) {
    %c0_i32 = arith.constant 0 : i32
    %c0_i32_0 = arith.constant 0 : i32
    %c0_i32_1 = arith.constant 0 : i32
    return %c0_i32, %c0_i32_0 : i32, i32
  }
  func.func @transform_6(%arg0: i32) -> (i32, i32) {
    %c0_i32 = arith.constant 0 : i32
    %c0_i32_0 = arith.constant 0 : i32
    %c0_i32_1 = arith.constant 0 : i32
    return %c0_i32, %c0_i32_0 : i32, i32
  }
  func.func @transform_7(%arg0: i32) -> (i32, i32, i32, i32) {
    %c0_i32 = arith.constant 0 : i32
    %c0_i32_0 = arith.constant 0 : i32
    %c0_i32_1 = arith.constant 0 : i32
    %c0_i32_2 = arith.constant 0 : i32
    return %arg0, %c0_i32, %c0_i32_0, %c0_i32_1 : i32, i32, i32, i32
  }
}

</mosaic_0001>

<bundles_post_ra>
// kernel: tpu_custom_call.1
= control target key start
LH: loop header
LB: loop body
LE: loop exit
PB: predicated region body
PF: predicated region fallthrough
CT: control target
= control target key end

     0   :  { %12 = vsyncpa [#allocation4], 0  ;;  %s3527_s0 = inlined_call_operand.vmem [shape: f32[2,2,2,9,9,8], index: 0, kind: input, shape index: {}]   ;;  %s3528_s1 = inlined_call_operand.vmem [shape: f32[9,8,128], index: 1, kind: input, shape index: {}]   ;;  %s3529_s2 = inlined_call_operand.vmem [shape: f32[1,128], index: 2, kind: input, shape index: {}]   ;;  %s3530_s3 = inlined_call_operand.vmem [shape: f32[9,128,128], index: 3, kind: input, shape index: {}]   ;;  %s3531_s4 = inlined_call_operand.vmem [shape: f32[1,128], index: 4, kind: input, shape index: {}]   ;;  %s3532_s5 = inlined_call_operand.vmem [shape: f32[8,128], index: 5, kind: input, shape index: {}]   ;;  %s3533_s6 = inlined_call_operand.vmem [shape: f32[1,128], index: 6, kind: input, shape index: {}]   ;;  %s3534_s7 = inlined_call_operand.hbm [shape: f32[2,8,8,128], index: 7, kind: output, shape index: {}]  }
   0x1   :  { %14 = vsyncpa [#allocation4 + $0x1], 0  ;;  %s2360_s24 = smov 0   ;;  %s2362_s25 = smov 0  }
   0x2   :  { %s2364_s26 = smov 0   ;;  %s2366_s27 = smov 0  }
   0x3 LB: > { %s2381_s28 = sadd.s32 4294967295, %s2315_s27   ;;  %s1912_s29 = sadd.s32 4294967294, %s2315_s27   ;;  %s2315_s27 = sphi %s2366_s27, %s3540_s27   ;;  %s2311_s26 = sphi %s2364_s26, %s3539_s26   ;;  %s2307_s25 = sphi %s2362_s25, %s3538_s25   ;;  %s2303_s24 = sphi %s2360_s24, %s3537_s24  }
   0x4   : > { %s2385_s30 = sadd.s32 1, %s2315_s27   ;;  %s179_s8 = sadd.s32 1, %s2311_s26 }
   0x5   : > { %s176_s9 = ssub.s32 %s2315_s27, %s2385_s30  ;;  %p189_p0 = scmp.ne.s32.totalorder %s2311_s26, %s2307_s25 }
   0x6   : > { %p177_p1 = scmp.eq.s32.totalorder %s176_s9, 0  ;;  %p190_p2 = scmp.eq.s32.totalorder %s2381_s28, 1 }
   0x7   : > { %p195_p3 = scmp.ne.s32.totalorder %s2307_s25, %s2303_s24  ;;  %p196_p4 = scmp.eq.s32.totalorder %s1912_s29, 1 }
   0x8   : > { %s2396_s10 = scalar_select %p177_p1, %s2311_s26, %s179_s8  }
   0x9   : > { %p2398_p5 = por %p190_p2, %p189_p0  ;;  %p2402_p6 = por %p196_p4, %p195_p3 }
   0xa   : > { %p1915_p7 = scmp.ge.s32.totalorder %s2315_s27, 1  ;;  %p240_p8 = scmp.lt.s32.totalorder %s2315_s27, 3 }
   0xc   : > { %p241_p9 = pnand %p1915_p7, %p240_p8 }
   0xd   : > { %p272_p10 = scmp.lt.s32.totalorder (!%p241_p9), %s2381_s28, 1  ;;  %s269_s16 = sand.u32 (!%p241_p9), 1, %s2307_s25  }
   0xe   : > { %244 = sbr.rel (%p241_p9) target bundleno = 629 (0x275), region = 48  ;;  %s1916_s19 = sshll.u32 (!%p241_p9), %s269_s16, 6 }
   0xf   : > { %s3449_s20 = scalar_lea.vmem (!%p241_p9), [#allocation3], %s1916_s19  ;;  %s2273_s18 = scalar_lea.hbm (!%p241_p9), %s3534_s7, 128 }
  0x10   : > { %s1847_s9 = sshll.u32 (!%p241_p9), %s3449_s20, 4  ;;  %s1848_s9 = int_to_ptr.vmem [resolvable:$true] %s1847_s9 }
  0x13   : > { %v1926_v0 = vld [vmem:[%s3528_s1 + $0x8] sm:$0xff]  ;;  %v1943_v1 = vld [vmem:[%s3528_s1 + $0x10] sm:$0xff]  ;;  %v285_v2 = vld [vmem:[%s3528_s1] sm:$0xff]  ;;  %s273_s21 = scalar_select %p272_p10, %s2381_s28, 1  ;;  %vm297_vm0 = vcmask 64512  }
  0x14   : > { %337 = vmatpush.msra.mxu0 %v1926_v0  ;;  %477 = vmatpush.msra.mxu2 %v1943_v1  ;;  %v1960_v3 = vld [vmem:[%s3528_s1 + $0x18] sm:$0xff]  ;;  %v1977_v25 = vld [vmem:[%s3528_s1 + $0x20] sm:$0xff]  ;;  %v2011_v30 = vld [vmem:[%s3528_s1 + $0x30] sm:$0xff] }
  0x15   : > { %2205 = vmatpush.msra.mxu3 %v1943_v1  ;;  %2204 = vmatpush.msra.mxu1 %v285_v2  ;;  %s2207_s22 = smul.u32 576, %s273_s21  ;;  %v2028_v12 = vld [vmem:[%s3528_s1 + $0x38] sm:$0xff]  ;;  %v2045_v34 = vld [vmem:[%s3528_s1 + $0x40] sm:$0xff]  ;;  %v1994_v35 = vld [vmem:[%s3528_s1 + $0x28] sm:$0xff]  ;;  %s2203_s21 = sshll.u32 %s2381_s28, 6 }
  0x16   : > { %402 = vmatpush.msrb.mxu0 %v285_v2  ;;  %812 = vmatpush.msrb.mxu2 %v2011_v30  ;;  %v2066_v30 = vld [vmem:[%s3530_s3 + $0xe0] sm:$0xff]  ;;  %s1846_s29 = scalar_lea.hbm %s3534_s7, %s2203_s21  ;;  %s1835_s28 = scalar_lea.sflag [#allocation4], %s269_s16 }
  0x17   : > { %561 = vmatpush.msrb.mxu3 %v1960_v3  ;;  %s2425_s8 = scalar_lea.vmem %s3527_s0, %s2207_s22  ;;  %728 = vmatpush.msrb.mxu1 %v1994_v35  ;;  %s1849_s13 = sshll.u32 %s1846_s29, 4  ;;  %s1850_s13 = int_to_ptr.hbm [resolvable:$true] %s1849_s13 }
  0x18   : > { %v1918_v4 = vld [vmem:[%s2425_s8 + $0x90] sm:$0xff]  ;;  %v428_v5 = vld [vmem:[%s2425_s8 + $0x1] sm:$0xff]  ;;  %s2267_s14 = sshra.s32 %s1850_s13, 4  ;;  %s2268_s14 = int_to_ptr.hbm [resolvable:$true] %s2267_s14 }
  0x19   : > { %v2430_v6 = vld [vmem:[%s2425_s8 + $0x61] sm:$0xff]  ;;  %1927 = vmatmul.msk.f32.vlgmr.msra.gmra.mxu0 %vm297_vm0, %v1918_v4  ;;  %1944 = vmatmul.msk.f32.vlgmr.msra.gmra.mxu2 %vm297_vm0, %v428_v5  ;;  %v2445_v9 = vld [vmem:[%s2425_s8 + $0x11] sm:$0xff]  ;;  %p2274_p0 = scmp.lt.s32.totalorder %s2268_s14, %s3534_s7 }
  0x1a   : > { %1950 = vmatmul.msk.f32.vlgmr.msra.gmra.mxu3 %vm297_vm0, %v2430_v6  ;;  %v2437_v7 = vld [vmem:[%s2425_s8 + $0x20] sm:$0xff]  ;;  %v2448_v10 = vld [vmem:[%s2425_s8 + $0x71] sm:$0xff]  ;;  %645 = vmatpush.msra.mxu0 %v1977_v25  ;;  %v2067_v25 = vld [vmem:[%s3530_s3 + $0xe8] sm:$0xff] }
  0x1b   : > { %1937 = vmatmul.msk.f32.vlgmr.msra.gmra.mxu1 %vm297_vm0, %v2437_v7  ;;  %v2442_v8 = vld [vmem:[%s2425_s8 + $0xa0] sm:$0xff]  ;;  %v2451_v11 = vld [vmem:[%s2425_s8 + $0x30] sm:$0xff]  ;;  %896 = vmatpush.msra.mxu3 %v2028_v12 }
  0x1c   : > { %v2465_v13 = vld [vmem:[%s2425_s8 + $0xb0] sm:$0xff]  ;;  %v2468_v14 = vld [vmem:[%s2425_s8 + $0x21] sm:$0xff] }
  0x1d   : > { %v1952_v15 = vld [vmem:[%s2425_s8 + $0x120] sm:$0xff]  ;;  %v2482_v18 = vld [vmem:[%s2425_s8 + $0x31] sm:$0xff] }
  0x1e   : > { %v281_v16 = vld [vmem:[%s2425_s8 + $0x40] sm:$0xff]  ;;  %v1953_v19 = vld [vmem:[%s2425_s8 + $0x130] sm:$0xff] }
  0x1f   : > { %v2479_v17 = vld [vmem:[%s2425_s8 + $0xc0] sm:$0xff]  ;;  %v282_v20 = vld [vmem:[%s2425_s8 + $0x50] sm:$0xff] }
  0x20   : > { %v2493_v21 = vld [vmem:[%s2425_s8 + $0xd0] sm:$0xff]  ;;  %v2496_v22 = vld [vmem:[%s2425_s8 + $0x41] sm:$0xff] }
  0x21   : > { %1928 = vmatmul.msk.f32.gmra.mxu0 %vm297_vm0, %v2442_v8  ;;  %1945 = vmatmul.msk.f32.gmra.mxu2 %vm297_vm0, %v2445_v9  ;;  %v1954_v23 = vld [vmem:[%s2425_s8 + $0x140] sm:$0xff]  ;;  %v2513_v27 = vld [vmem:[%s2425_s8 + $0x51] sm:$0xff] }
  0x22   : > { %1951 = vmatmul.msk.f32.gmra.mxu3 %vm297_vm0, %v2448_v10  ;;  %v283_v24 = vld [vmem:[%s2425_s8 + $0x60] sm:$0xff]  ;;  %v1955_v28 = vld [vmem:[%s2425_s8 + $0x150] sm:$0xff] }
  0x23   : > { %1938 = vmatmul.msk.f32.gmra.mxu1 %vm297_vm0, %v2451_v11  ;;  %v2510_v26 = vld [vmem:[%s2425_s8 + $0xe0] sm:$0xff]  ;;  %v284_v29 = vld [vmem:[%s2425_s8 + $0x70] sm:$0xff] }
  0x24   : > { %v2527_v31 = vld [vmem:[%s2425_s8 + $0xf0] sm:$0xff]  ;;  %v1956_v32 = vld [vmem:[%s2425_s8 + $0x160] sm:$0xff] }
  0x25   : > { %v278_v33 = vld [vmem:[%s2425_s8 + $0x10] sm:$0xff]  ;;  %v1986_v36 = vld [vmem:[%s2425_s8 + $0x121] sm:$0xff] }
  0x26   : > { %v1925_v37 = vld [vmem:[%s2425_s8 + $0x100] sm:$0xff]  ;;  %v1957_v38 = vld [vmem:[%s2425_s8 + $0x170] sm:$0xff] }
  0x27   : > { %v1987_v39 = vld [vmem:[%s2425_s8 + $0x131] sm:$0xff]  ;;  %v277_v40 = vld [vmem:[%s2425_s8] sm:$0xff] }
  0x28   : > { %v1958_v41 = vld [vmem:[%s2425_s8 + $0x180] sm:$0xff]  ;;  %v1959_v43 = vld [vmem:[%s2425_s8 + $0x190] sm:$0xff] }
  0x29   : > { %1929 = vmatmul.msk.f32.gmra.mxu0 %vm297_vm0, %v2465_v13  ;;  %1946 = vmatmul.msk.f32.gmra.mxu2 %vm297_vm0, %v2468_v14  ;;  %v1988_v42 = vld [vmem:[%s2425_s8 + $0x141] sm:$0xff]  ;;  %v1989_v44 = vld [vmem:[%s2425_s8 + $0x151] sm:$0xff] }
  0x2a   : > { %1961 = vmatmul.msk.f32.vlgmr.msrb.gmra.mxu3 %vm297_vm0, %v1952_v15  ;;  %v1969_v45 = vld [vmem:[%s2425_s8 + $0x1b0] sm:$0xff]  ;;  %v1990_v46 = vld [vmem:[%s2425_s8 + $0x161] sm:$0xff] }
  0x2b   : > { %1939 = vmatmul.msk.f32.gmra.mxu1 %vm297_vm0, %v281_v16  ;;  %2206 = vmatpush.msrb.mxu3 %v2045_v34  ;;  %v1970_v47 = vld [vmem:[%s2425_s8 + $0x1c0] sm:$0xff]  ;;  %v1991_v48 = vld [vmem:[%s2425_s8 + $0x171] sm:$0xff] }
  0x2c   : > { %v1971_v49 = vld [vmem:[%s2425_s8 + $0x1d0] sm:$0xff]  ;;  %v1992_v50 = vld [vmem:[%s2425_s8 + $0x181] sm:$0xff] }
  0x2d   : > { %v1972_v51 = vld [vmem:[%s2425_s8 + $0x1e0] sm:$0xff]  ;;  %v1993_v53 = vld [vmem:[%s2425_s8 + $0x191] sm:$0xff] }
  0x2e   : > { %v2010_v52 = vld [vmem:[%s2425_s8 + $0x80] sm:$0xff]  ;;  %v1973_v54 = vld [vmem:[%s2425_s8 + $0x1f0] sm:$0xff] }
  0x2f   : > { %v1974_v55 = vld [vmem:[%s2425_s8 + $0x200] sm:$0xff]  ;;  %v1975_v57 = vld [vmem:[%s2425_s8 + $0x210] sm:$0xff] }
  0x30   : > { %v1976_v60 = vld [vmem:[%s2425_s8 + $0x220] sm:$0xff]  ;;  %v2027_v61 = vld [vmem:[%s2425_s8 + $0x110] sm:$0xff] }
  0x31   : > { %1930 = vmatmul.msk.f32.gmra.mxu0 %vm297_vm0, %v2479_v17  ;;  %1947 = vmatmul.msk.f32.gmra.mxu2 %vm297_vm0, %v2482_v18 }
  0x32   : > { %1962 = vmatmul.msk.f32.gmra.mxu3 %vm297_vm0, %v1953_v19  ;;  %v1084_v19 = vld [vmem:[%s3530_s3 + $0x70] sm:$0xff] }
  0x33   : > { %1940 = vmatmul.msk.f32.gmra.mxu1 %vm297_vm0, %v282_v20 }
  0x39   : > { %1931 = vmatmul.msk.f32.gmra.mxu0 %vm297_vm0, %v2493_v21  ;;  %1948 = vmatmul.msk.f32.gmra.mxu2 %vm297_vm0, %v2496_v22 }
  0x3a   : > { %1963 = vmatmul.msk.f32.gmra.mxu3 %vm297_vm0, %v1954_v23  ;;  %v1083_v23 = vld [vmem:[%s3530_s3 + $0x68] sm:$0xff] }
  0x3b   : > { %1941 = vmatmul.msk.f32.gmra.mxu1 %vm297_vm0, %v283_v24 }
  0x41   : > { %1932 = vmatmul.msk.f32.gmra.mxu0 %vm297_vm0, %v2510_v26  ;;  %1949 = vmatmul.msk.f32.gmra.mxu2 %vm297_vm0, %v2513_v27 }
  0x42   : > { %1964 = vmatmul.msk.f32.gmra.mxu3 %vm297_vm0, %v1955_v28 }
  0x43   : > { %1942 = vmatmul.msk.f32.gmra.mxu1 %vm297_vm0, %v284_v29 }
  0x49   : > { %1933 = vmatmul.msk.f32.gmra.mxu0 %vm297_vm0, %v2527_v31  ;;  %2012 = vmatmul.msk.f32.vlgmr.msrb.gmra.mxu2 %vm297_vm0, %v278_v33 }
  0x4a   : > { %1965 = vmatmul.msk.f32.gmra.mxu3 %vm297_vm0, %v1956_v32 }
  0x4b   : > { %1995 = vmatmul.msk.f32.vlgmr.msrb.gmra.mxu1 %vm297_vm0, %v1986_v36 }
  0x51   : > { %1934 = vmatmul.msk.f32.gmra.mxu0 %vm297_vm0, %v1925_v37  ;;  %2013 = vmatmul.msk.f32.gmra.mxu2 %vm297_vm0, %v2437_v7 }
  0x52   : > { %1966 = vmatmul.msk.f32.gmra.mxu3 %vm297_vm0, %v1957_v38  ;;  %v2064_v38 = vld [vmem:[%s3530_s3 + $0xd0] sm:$0xff] }
  0x53   : > { %1996 = vmatmul.msk.f32.gmra.mxu1 %vm297_vm0, %v1987_v39  ;;  %v1079_v39 = vld [vmem:[%s3530_s3 + $0x48] sm:$0xff] }
  0x59   : > { %1935 = vmatmul.msk.f32.vlgmr.msrb.gmra.mxu0 %vm297_vm0, %v277_v40  ;;  %2014 = vmatmul.msk.f32.gmra.mxu2 %vm297_vm0, %v2451_v11  ;;  %v2063_v40 = vld [vmem:[%s3530_s3 + $0xc8] sm:$0xff] }
  0x5a   : > { %1967 = vmatmul.msk.f32.gmra.mxu3 %vm297_vm0, %v1958_v41  ;;  %979 = vmatpush.msrb.mxu0 %v2045_v34  ;;  %v1080_v34 = vld [vmem:[%s3530_s3 + $0x50] sm:$0xff]  ;;  %v1078_v41 = vld [vmem:[%s3530_s3 + $0x40] sm:$0xff] }
  0x5b   : > { %1997 = vmatmul.msk.f32.gmra.mxu1 %vm297_vm0, %v1988_v42 }
  0x61   : > { %1936 = vmatmul.msk.f32.gmra.mxu0 %vm297_vm0, %v278_v33  ;;  %2015 = vmatmul.msk.f32.gmra.mxu2 %vm297_vm0, %v281_v16  ;;  %v1085_v16 = vld [vmem:[%s3530_s3 + $0x78] sm:$0xff] }
  0x62   : > { %1968 = vmatmul.msk.f32.gmra.mxu3 %vm297_vm0, %v1959_v43  ;;  %1152 = vmatpush.msra.mxu2 %v1085_v16  ;;  %v2065_v33 = vld [vmem:[%s3530_s3 + $0xd8] sm:$0xff] }
  0x63   : > { %1998 = vmatmul.msk.f32.gmra.mxu1 %vm297_vm0, %v1989_v44 }
  0x64   : > { %1153 = vmatpush.msra.mxu2 %v1084_v19  ;;  %v2080_v19 = vld [vmem:[%s3530_s3 + $0x150] sm:$0xff] }
  0x66   : > { %1154 = vmatpush.msra.mxu2 %v1083_v23  ;;  %v2059_v23 = vld [vmem:[%s3530_s3 + $0xa8] sm:$0xff] }
  0x69   : > { %1978 = vmatmul.msk.f32.vlgmr.msra.gmra.mxu0 %vm297_vm0, %v1969_v45  ;;  %2016 = vmatmul.msk.f32.gmra.mxu2 %vm297_vm0, %v282_v20  ;;  %v2062_v45 = vld [vmem:[%s3530_s3 + $0xc0] sm:$0xff] }
  0x6a   : > { %2029 = vmatmul.msk.f32.vlgmr.msra.gmra.mxu3 %vm297_vm0, %v2442_v8 }
  0x6b   : > { %1999 = vmatmul.msk.f32.gmra.mxu1 %vm297_vm0, %v1990_v46  ;;  %v1077_v46 = vld [vmem:[%s3530_s3 + $0x38] sm:$0xff] }
  0x71   : > { %1979 = vmatmul.msk.f32.gmra.mxu0 %vm297_vm0, %v1970_v47  ;;  %2017 = vmatmul.msk.f32.gmra.mxu2 %vm297_vm0, %v283_v24  ;;  %v2085_v47 = vld [vmem:[%s3530_s3 + $0x178] sm:$0xff] }
  0x72   : > { %2030 = vmatmul.msk.f32.gmra.mxu3 %vm297_vm0, %v2465_v13 }
  0x73   : > { %2000 = vmatmul.msk.f32.gmra.mxu1 %vm297_vm0, %v1991_v48  ;;  %1218 = vmatpush.msra.mxu3 %v2085_v47  ;;  %v2317_v47 = vmov 0.0  }
  0x74   : > { %1035 = vst [vmem:[#allocation2 + $0x10] sm:$0xff] %v2317_v47 }
  0x75   : > { %1036 = vst [vmem:[#allocation2 + $0x18] sm:$0x3] %v2317_v47 }
  0x76   : > { %1033 = vst [vmem:[#allocation2] sm:$0xff] %v2317_v47 }
  0x77   : > { %1034 = vst [vmem:[#allocation2 + $0x8] sm:$0x3] %v2317_v47 }
  0x78   : > { %1037 = vst [vmem:[#allocation2 + $0x20] sm:$0xff] %v2317_v47 }
  0x79   : > { %1980 = vmatmul.msk.f32.gmra.mxu0 %vm297_vm0, %v1971_v49  ;;  %2018 = vmatmul.msk.f32.gmra.mxu2 %vm297_vm0, %v284_v29  ;;  %v2084_v49 = vld [vmem:[%s3530_s3 + $0x170] sm:$0xff]  ;;  %1038 = vst [vmem:[#allocation2 + $0x28] sm:$0x3] %v2317_v47 }
  0x7a   : > { %2031 = vmatmul.msk.f32.gmra.mxu3 %vm297_vm0, %v2479_v17  ;;  %1039 = vst [vmem:[#allocation2 + $0x30] sm:$0xff] %v2317_v47 }
  0x7b   : > { %2001 = vmatmul.msk.f32.gmra.mxu1 %vm297_vm0, %v1992_v50  ;;  %v2061_v50 = vld [vmem:[%s3530_s3 + $0xb8] sm:$0xff]  ;;  %1219 = vmatpush.msra.mxu3 %v2084_v49  ;;  %1040 = vst [vmem:[#allocation2 + $0x38] sm:$0x3] %v2317_v47 }
  0x7c   : > { %v2057_v49 = vld [vmem:[%s3530_s3 + $0x98] sm:$0xff]  ;;  %1041 = vst [vmem:[#allocation2 + $0x40] sm:$0xff] %v2317_v47 }
  0x7d   : > { %1042 = vst [vmem:[#allocation2 + $0x48] sm:$0x3] %v2317_v47 }
  0x7e   : > { %1043 = vst [vmem:[#allocation2 + $0x50] sm:$0xff] %v2317_v47 }
  0x7f   : > { %1044 = vst [vmem:[#allocation2 + $0x58] sm:$0x3] %v2317_v47 }
  0x80   : > { %1045 = vst [vmem:[#allocation2 + $0x60] sm:$0xff] %v2317_v47 }
  0x81   : > { %1981 = vmatmul.msk.f32.gmra.mxu0 %vm297_vm0, %v1972_v51  ;;  %2019 = vmatmul.msk.f32.gmra.mxu2 %vm297_vm0, %v2010_v52  ;;  %v1076_v51 = vld [vmem:[%s3530_s3 + $0x30] sm:$0xff]  ;;  %v2083_v52 = vld [vmem:[%s3530_s3 + $0x168] sm:$0xff]  ;;  %1046 = vst [vmem:[#allocation2 + $0x68] sm:$0x3] %v2317_v47 }
  0x82   : > { %2032 = vmatmul.msk.f32.gmra.mxu3 %vm297_vm0, %v2493_v21  ;;  %1047 = vst [vmem:[#allocation2 + $0x70] sm:$0xff] %v2317_v47 }
  0x83   : > { %2002 = vmatmul.msk.f32.gmra.mxu1 %vm297_vm0, %v1993_v53  ;;  %1220 = vmatpush.msra.mxu3 %v2083_v52  ;;  %v2056_v52 = vld [vmem:[%s3530_s3 + $0x90] sm:$0xff]  ;;  %1048 = vst [vmem:[#allocation2 + $0x78] sm:$0x3] %v2317_v47 }
  0x84   : > { %1049 = vst [vmem:[#allocation2 + $0x80] sm:$0xff] %v2317_v47 }
  0x85   : > { %1050 = vst [vmem:[#allocation2 + $0x88] sm:$0x3] %v2317_v47 }
  0x86   : > { %1051 = vst [vmem:[#allocation2 + $0x90] sm:$0xff] %v2317_v47 }
  0x87   : > { %1052 = vst [vmem:[#allocation2 + $0x98] sm:$0x3] %v2317_v47 }
  0x89   : > { %1982 = vmatmul.msk.f32.gmra.mxu0 %vm297_vm0, %v1973_v54  ;;  %v2082_v54 = vld [vmem:[%s3530_s3 + $0x160] sm:$0xff] }
  0x8a   : > { %2033 = vmatmul.msk.f32.gmra.mxu3 %vm297_vm0, %v2510_v26  ;;  %v1082_v26 = vld [vmem:[%s3530_s3 + $0x60] sm:$0xff] }
  0x8b   : > { %1155 = vmatpush.msra.mxu2 %v1082_v26  ;;  %1221 = vmatpush.msra.mxu3 %v2082_v54  ;;  %v2079_v26 = vld [vmem:[%s3530_s3 + $0x148] sm:$0xff] }
  0x91   : > { %1983 = vmatmul.msk.f32.gmra.mxu0 %vm297_vm0, %v1974_v55 }
  0x92   : > { %2034 = vmatmul.msk.f32.gmra.mxu3 %vm297_vm0, %v2527_v31  ;;  %v1081_v31 = vld [vmem:[%s3530_s3 + $0x58] sm:$0xff] }
  0x93   : > { %1156 = vmatpush.msra.mxu2 %v1081_v31  ;;  %v2078_v31 = vld [vmem:[%s3530_s3 + $0x140] sm:$0xff] }
  0x95   : > { %1157 = vmatpush.msra.mxu2 %v1080_v34  ;;  %v2058_v34 = vld [vmem:[%s3530_s3 + $0xa0] sm:$0xff] }
  0x96   : > { %v2602_v56 = vpop.f32.mrf.mxu0 }
  0x97   : > { %1158 = vmatpush.msra.mxu2 %v1079_v39 }
  0x98   : > { %v2635_v4 = vpop.f32.mrf.mxu1 }
  0x99   : > { %1984 = vmatmul.msk.f32.gmra.mxu0 %vm297_vm0, %v1975_v57  ;;  %1159 = vmatpush.msra.mxu2 %v1078_v41  ;;  %v1073_v41 = vld [vmem:[%s3530_s3 + $0x18] sm:$0xff] }
  0x9a   : > { %2035 = vmatmul.msk.f32.gmra.mxu3 %vm297_vm0, %v1925_v37 }
  0x9b   : > { %1160 = vmatpush.msra.mxu2 %v1077_v46  ;;  %v2097_v46 = vld [vmem:[%s3530_s3 + $0x1d8] sm:$0xff] }
  0x9c   : > { %v2641_v5 = vpop.f32.mrf.mxu2 }
  0x9d   : > { %v2607_v58 = vpop.f32.mrf.mxu3  ;;  %1161 = vmatpush.msra.mxu2 %v1076_v51  ;;  %v2096_v51 = vld [vmem:[%s3530_s3 + $0x1d0] sm:$0xff] }
  0x9e   : > { %v2609_v59 = vpop.f32.mrf.mxu0 }
  0xa1   : > { %1985 = vmatmul.msk.f32.gmra.mxu0 %vm297_vm0, %v1976_v60  ;;  %v2060_v60 = vld [vmem:[%s3530_s3 + $0xb0] sm:$0xff] }
  0xa2   : > { %2036 = vmatmul.msk.f32.gmra.mxu3 %vm297_vm0, %v2027_v61  ;;  %v1075_v61 = vld [vmem:[%s3530_s3 + $0x28] sm:$0xff] }
  0xa3   : > { %1162 = vmatpush.msra.mxu2 %v1075_v61  ;;  %v2075_v61 = vld [vmem:[%s3530_s3 + $0x128] sm:$0xff] }
  0xa4   : > { %v2657_v13 = vpop.f32.mrf.mxu2 }
  0xa5   : > { %v2615_v62 = vpop.f32.mrf.mxu3 }
  0xa6   : > { %v2617_v63 = vpop.f32.mrf.mxu0 }
  0xa9   : > { %2046 = vmatmul.msk.f32.vlgmr.msrb.gmra.mxu0 %vm297_vm0, %v2445_v9  ;;  %v2044_v9 = vld [vmem:[%s2425_s8 + $0x81] sm:$0xff] }
  0xaa   : > { %2050 = vmatmul.msk.f32.vlgmr.msrb.gmra.mxu3 %vm297_vm0, %v2513_v27 }
  0xac   : > { %v2668_v17 = vpop.f32.mrf.mxu2 }
  0xad   : > { %v2623_v0 = vpop.f32.mrf.mxu3 }
  0xae   : > { %v2625_v1 = vpop.f32.mrf.mxu0 }
  0xb1   : > { %2047 = vmatmul.msk.f32.gmra.mxu0 %vm297_vm0, %v2468_v14 }
  0xb2   : > { %2051 = vmatmul.msk.f32.gmra.mxu3 %vm297_vm0, %v2430_v6  ;;  %v2651_v6 = vpop.f32.mrf.mxu1 }
  0xb4   : > { %v2694_v27 = vpop.f32.mrf.mxu2 }
  0xb5   : > { %v2631_v2 = vpop.f32.mrf.mxu3 }
  0xb6   : > { %v2633_v3 = vpop.f32.mrf.mxu0 }
  0xb9   : > { %2048 = vmatmul.msk.f32.gmra.mxu0 %vm297_vm0, %v2482_v18  ;;  %v2069_v18 = vld [vmem:[%s3530_s3 + $0xf8] sm:$0xff] }
  0xba   : > { %2052 = vmatmul.msk.f32.gmra.mxu3 %vm297_vm0, %v2448_v10  ;;  %v2659_v10 = vpop.f32.mrf.mxu1  ;;  %1111 = vmatpush.msra.mxu1 %v2069_v18  ;;  %v2101_v18 = vld [vmem:[%s3530_s3 + $0x1f8] sm:$0xff] }
  0xbb   : > { %1292 = vmatpush.msra.mxu0 %v2101_v18  ;;  %v2055_v18 = vld [vmem:[%s3530_s3 + $0x88] sm:$0xff] }
  0xbc   : > { %v2714_v35 = vpop.f32.mrf.mxu2 }
  0xbd   : > { %v2643_v7 = vpop.f32.mrf.mxu3 }
  0xbe   : > { %v2645_v8 = vpop.f32.mrf.mxu0 }
  0xc1   : > { %2049 = vmatmul.msk.f32.gmra.mxu0 %vm297_vm0, %v2496_v22  ;;  %v2068_v22 = vld [vmem:[%s3530_s3 + $0xf0] sm:$0xff] }
  0xc2   : > { %2053 = vmatmul.msk.f32.gmra.mxu3 %vm297_vm0, %v2044_v9  ;;  %v2686_v24 = vpop.f32.mrf.mxu1  ;;  %1112 = vmatpush.msra.mxu1 %v2068_v22  ;;  %v2081_v9 = vld [vmem:[%s3530_s3 + $0x158] sm:$0xff]  ;;  %v2100_v22 = vld [vmem:[%s3530_s3 + $0x1f0] sm:$0xff] }
  0xc3   : > { %1222 = vmatpush.msra.mxu3 %v2081_v9  ;;  %1293 = vmatpush.msra.mxu0 %v2100_v22  ;;  %v2095_v9 = vld [vmem:[%s3530_s3 + $0x1c8] sm:$0xff]  ;;  %v2094_v22 = vld [vmem:[%s3530_s3 + $0x1c0] sm:$0xff] }
  0xc4   : > { %1113 = vmatpush.msra.mxu1 %v2067_v25  ;;  %v2747_v48 = vpop.f32.mrf.mxu2  ;;  %v1074_v25 = vld [vmem:[%s3530_s3 + $0x20] sm:$0xff] }
  0xc5   : > { %v2653_v11 = vpop.f32.mrf.mxu3  ;;  %1223 = vmatpush.msra.mxu3 %v2080_v19  ;;  %1163 = vmatpush.msra.mxu2 %v1074_v25  ;;  %v2074_v19 = vld [vmem:[%s3530_s3 + $0x120] sm:$0xff] }
  0xc6   : > { %v2655_v12 = vpop.f32.mrf.mxu0  ;;  %1114 = vmatpush.msra.mxu1 %v2066_v30  ;;  %v2099_v30 = vld [vmem:[%s3530_s3 + $0x1e8] sm:$0xff] }
  0xc7   : > { %1224 = vmatpush.msra.mxu3 %v2079_v26  ;;  %1294 = vmatpush.msra.mxu0 %v2099_v30  ;;  %v1071_v30 = vld [vmem:[%s3530_s3 + $0x8] sm:$0xff] }
  0xc8   : > { %1115 = vmatpush.msra.mxu1 %v2065_v33  ;;  %v2098_v33 = vld [vmem:[%s3530_s3 + $0x1e0] sm:$0xff]  ;;  %1164 = vmatpush.msra.mxu2 %v1073_v41  ;;  %v2072_v41 = vld [vmem:[%s3530_s3 + $0x110] sm:$0xff] }
  0xc9   : > { %1225 = vmatpush.msra.mxu3 %v2078_v31  ;;  %1295 = vmatpush.msra.mxu0 %v2098_v33  ;;  %v2073_v31 = vld [vmem:[%s3530_s3 + $0x118] sm:$0xff] }
  0xca   : > { %v2706_v32 = vpop.f32.mrf.mxu1  ;;  %1116 = vmatpush.msra.mxu1 %v2064_v38  ;;  %v2093_v33 = vld [vmem:[%s3530_s3 + $0x1b8] sm:$0xff] }
  0xcb   : > { %1296 = vmatpush.msra.mxu0 %v2097_v46  ;;  %v1086_v46 = vld [vmem:[#allocation2 + $0x1] sm:$0xff] }
  0xcc   : > { %1117 = vmatpush.msra.mxu1 %v2063_v40  ;;  %v2779_v16 = vpop.f32.mrf.mxu2 }
  0xcd   : > { %v2661_v14 = vpop.f32.mrf.mxu3  ;;  %1297 = vmatpush.msra.mxu0 %v2096_v51  ;;  %v2091_v51 = vld [vmem:[%s3530_s3 + $0x1a8] sm:$0xff] }
  0xce   : > { %v2663_v15 = vpop.f32.mrf.mxu0  ;;  %1118 = vmatpush.msra.mxu1 %v2062_v45  ;;  %v2077_v45 = vld [vmem:[%s3530_s3 + $0x138] sm:$0xff] }
  0xcf   : > { %1226 = vmatpush.msra.mxu3 %v2077_v45  ;;  %1298 = vmatpush.msra.mxu0 %v2095_v9  ;;  %v2092_v45 = vld [vmem:[%s3530_s3 + $0x1b0] sm:$0xff] }
  0xd0   : > { %1119 = vmatpush.msra.mxu1 %v2061_v50  ;;  %v2076_v50 = vld [vmem:[%s3530_s3 + $0x130] sm:$0xff] }
  0xd1   : > { %1227 = vmatpush.msra.mxu3 %v2076_v50  ;;  %1299 = vmatpush.msra.mxu0 %v2094_v22  ;;  %v2071_v50 = vld [vmem:[%s3530_s3 + $0x108] sm:$0xff]  ;;  %v2089_v22 = vld [vmem:[%s3530_s3 + $0x198] sm:$0xff] }
  0xd2   : > { %v2732_v42 = vpop.f32.mrf.mxu1  ;;  %1120 = vmatpush.msra.mxu1 %v2060_v60  ;;  %v1072_v60 = vld [vmem:[%s3530_s3 + $0x10] sm:$0xff] }
  0xd3   : > { %1165 = vmatpush.msra.mxu2 %v1072_v60  ;;  %1228 = vmatpush.msra.mxu3 %v2075_v61  ;;  %v2070_v60 = vld [vmem:[%s3530_s3 + $0x100] sm:$0xff] }
  0xd4   : > { %1121 = vmatpush.msra.mxu1 %v2059_v23  ;;  %v2841_v54 = vpop.f32.mrf.mxu2  ;;  %v2054_v23 = vld [vmem:[%s3530_s3 + $0x80] sm:$0xff]  ;;  %1300 = vmatpush.msra.mxu0 %v2093_v33  ;;  %v2087_v33 = vld [vmem:[%s3530_s3 + $0x188] sm:$0xff] }
  0xd5   : > { %v2676_v20 = vpop.f32.mrf.mxu3  ;;  %1229 = vmatpush.msra.mxu3 %v2074_v19  ;;  %1166 = vmatpush.msra.mxu2 %v1071_v30  ;;  %v2090_v61 = vld [vmem:[%s3530_s3 + $0x1a0] sm:$0xff]  ;;  %v2088_v30 = vld [vmem:[%s3530_s3 + $0x190] sm:$0xff] }
  0xd6   : > { %v2678_v21 = vpop.f32.mrf.mxu0  ;;  %1122 = vmatpush.msra.mxu1 %v2058_v34  ;;  %1301 = vmatpush.msra.mxu0 %v2092_v45 }
  0xd7   : > { %1230 = vmatpush.msra.mxu3 %v2073_v31 }
  0xd8   : > { %1123 = vmatpush.msra.mxu1 %v2057_v49  ;;  %v1070_v49 = vld [vmem:[%s3530_s3] sm:$0xff]  ;;  %1302 = vmatpush.msra.mxu0 %v2091_v51 }
  0xd9   : > { %1231 = vmatpush.msra.mxu3 %v2072_v41  ;;  %1167 = vmatpush.msra.mxu2 %v1070_v49  ;;  %v2086_v41 = vld [vmem:[%s3530_s3 + $0x180] sm:$0xff]  ;;  %v2117_v49 = vld [vmem:[%s3530_s3 + $0x278] sm:$0xff] }
  0xda   : > { %v2761_v53 = vpop.f32.mrf.mxu1  ;;  %1124 = vmatpush.msra.mxu1 %v2056_v52  ;;  %1168 = vmatmul.f32.vlgmr.msra.gmra.mxu2 %v2317_v47 }
  0xdb   : > { %1232 = vmatpush.msra.mxu3 %v2071_v50  ;;  %1303 = vmatpush.msra.mxu0 %v2090_v61 }
  0xdc   : > { %1125 = vmatpush.msra.mxu1 %v2055_v18  ;;  %v2904_v52 = vpop.f32.mrf.mxu2  ;;  %v1193_v18 = vld [vmem:[#allocation2 + $0x2] sm:$0xff] }
  0xdd   : > { %v2696_v28 = vpop.f32.mrf.mxu3  ;;  %1233 = vmatpush.msra.mxu3 %v2070_v60  ;;  %1304 = vmatpush.msra.mxu0 %v2089_v22 }
  0xde   : > { %v2698_v29 = vpop.f32.mrf.mxu0  ;;  %1126 = vmatpush.msra.mxu1 %v2054_v23  ;;  %v405_v23 = vadd.f32 %v2678_v21, %v2602_v56  ;;  %1234 = vmatmul.f32.vlgmr.msra.gmra.mxu3 %v1193_v18  ;;  %v2133_v21 = vld [vmem:[%s3530_s3 + $0x2f8] sm:$0xff]  ;;  %v417_v18 = vadd.f32 %v2659_v10, %v2633_v3  ;;  %v2115_v3 = vld [vmem:[%s3530_s3 + $0x268] sm:$0xff] }
  0xdf   : > { %1127 = vmatmul.f32.vlgmr.msra.gmra.mxu1 %v1086_v46  ;;  %1305 = vmatpush.msra.mxu0 %v2088_v30  ;;  %v408_v51 = vadd.f32 %v2698_v29, %v2609_v59  ;;  %v2131_v59 = vld [vmem:[%s3530_s3 + $0x2e8] sm:$0xff] }
  0xe0   : > { %v503_v56 = vadd.f32 %v2641_v5, %v405_v23  ;;  %1440 = vmatpush.msrb.mxu2 %v2133_v21  ;;  %v2132_v5 = vld [vmem:[%s3530_s3 + $0x2f0] sm:$0xff]  ;;  %1366 = vmatpush.msrb.mxu1 %v2117_v49  ;;  %v507_v30 = vadd.f32 %v2714_v35, %v417_v18  ;;  %v420_v49 = vadd.f32 %v2686_v24, %v2645_v8 }
  0xe1   : > { %1306 = vmatpush.msra.mxu0 %v2087_v33  ;;  %v504_v22 = vadd.f32 %v2657_v13, %v408_v51  ;;  %v2116_v33 = vld [vmem:[%s3530_s3 + $0x270] sm:$0xff]  ;;  %v2130_v13 = vld [vmem:[%s3530_s3 + $0x2e0] sm:$0xff]  ;;  %v423_v18 = vadd.f32 %v2706_v32, %v2655_v12 }
  0xe2   : > { %v2811_v38 = vpop.f32.mrf.mxu1  ;;  %v587_v60 = vadd.f32 %v2623_v0, %v503_v56  ;;  %1441 = vmatpush.msrb.mxu2 %v2132_v5  ;;  %1367 = vmatpush.msrb.mxu1 %v2116_v33  ;;  %v591_v10 = vadd.f32 %v2661_v14, %v507_v30  ;;  %v411_v5 = vadd.f32 %v2635_v4, %v2617_v63  ;;  %v3005_v63 = vld [vmem:[%s3529_s2] ss:$0 sm:$0xff]  ;;  %v2113_v4 = vld [vmem:[%s3530_s3 + $0x258] sm:$0xff]  ;;  %v2112_v32 = vld [vmem:[%s3530_s3 + $0x250] sm:$0xff] }
  0xe3   : > { %1307 = vmatpush.msra.mxu0 %v2086_v41  ;;  %v508_v14 = vadd.f32 %v2747_v48, %v420_v49  ;;  %v426_v49 = vadd.f32 %v2732_v42, %v2663_v15  ;;  %v2109_v42 = vld [vmem:[%s3530_s3 + $0x238] sm:$0xff] }
  0xe4   : > { %v2944_v45 = vpop.f32.mrf.mxu2  ;;  %1442 = vmatpush.msrb.mxu2 %v2131_v59  ;;  %1368 = vmatpush.msrb.mxu1 %v2115_v3  ;;  %v509_v3 = vadd.f32 %v2607_v58, %v423_v18 }
  0xe5   : > { %v2716_v36 = vpop.f32.mrf.mxu3 }
  0xe6   : > { %v2718_v37 = vpop.f32.mrf.mxu0  ;;  %1443 = vmatpush.msrb.mxu2 %v2130_v13 }
  0xe7   : > { %v671_v61 = vadd.f32 %v2718_v37, %v587_v60  ;;  %v588_v37 = vadd.f32 %v2631_v2, %v504_v22  ;;  %v2114_v2 = vld [vmem:[%s3530_s3 + $0x260] sm:$0xff] }
  0xe8   : > { %1369 = vmatpush.msrb.mxu1 %v2114_v2  ;;  %v2147_v2 = vld [vmem:[%s3530_s3 + $0x368] sm:$0xff] }
  0xe9   : > { %v754_v0 = vadd.f32 %v2761_v53, %v671_v61 }
  0xea   : > { %v2883_v34 = vpop.f32.mrf.mxu1  ;;  %1370 = vmatpush.msrb.mxu1 %v2113_v4 }
  0xeb   : > { %v838_v21 = vadd.f32 %v2779_v16, %v754_v0  ;;  %v505_v16 = vadd.f32 %v2668_v17, %v411_v5  ;;  %v2128_v17 = vld [vmem:[%s3530_s3 + $0x2d0] sm:$0xff] }
  0xec   : > { %v826_v56 = vpop.f32.mrf.mxu2  ;;  %1371 = vmatpush.msrb.mxu1 %v2112_v32 }
  0xed   : > { %v2734_v43 = vpop.f32.mrf.mxu3 }
  0xee   : > { %v2736_v44 = vpop.f32.mrf.mxu0 }
  0xef   : > { %v672_v41 = vadd.f32 %v2736_v44, %v588_v37  ;;  %v922_v44 = vadd.f32 %v2734_v43, %v838_v21  ;;  %v592_v43 = vadd.f32 %v2676_v20, %v508_v14  ;;  %v414_v20 = vadd.f32 %v2651_v6, %v2625_v1  ;;  %v2111_v6 = vld [vmem:[%s3530_s3 + $0x248] sm:$0xff]  ;;  %v2149_v37 = vld [vmem:[%s3530_s3 + $0x378] sm:$0xff] }
  0xf0   : > { %1515 = vmatpush.msrb.mxu3 %v2149_v37  ;;  %1372 = vmatpush.msrb.mxu1 %v2111_v6 }
  0xf1   : > { %v755_v8 = vadd.f32 %v2811_v38, %v672_v41  ;;  %v589_v38 = vadd.f32 %v2643_v7, %v505_v16  ;;  %v2148_v41 = vld [vmem:[%s3530_s3 + $0x370] sm:$0xff] }
  0xf2   : > { %v2931_v31 = vpop.f32.mrf.mxu1  ;;  %1516 = vmatpush.msrb.mxu3 %v2148_v41  ;;  %v2105_v41 = vld [vmem:[%s3530_s3 + $0x218] sm:$0xff] }
  0xf3   : > { %v839_v30 = vadd.f32 %v2841_v54, %v755_v8  ;;  %v506_v54 = vadd.f32 %v2694_v27, %v414_v20  ;;  %v593_v27 = vadd.f32 %v2696_v28, %v509_v3  ;;  %v2110_v28 = vld [vmem:[%s3530_s3 + $0x240] sm:$0xff]  ;;  %v2144_v20 = vld [vmem:[%s3530_s3 + $0x350] sm:$0xff]  ;;  %v2107_v3 = vld [vmem:[%s3530_s3 + $0x228] sm:$0xff] }
  0xf4   : > { %v829_v59 = vpop.f32.mrf.mxu2  ;;  %1373 = vmatpush.msrb.mxu1 %v2110_v28  ;;  %1517 = vmatpush.msrb.mxu3 %v2147_v2 }
  0xf5   : > { %v2766_v55 = vpop.f32.mrf.mxu3 }
  0xf6   : > { %v2768_v57 = vpop.f32.mrf.mxu0  ;;  %1374 = vmatpush.msrb.mxu1 %v2109_v42  ;;  %v2140_v42 = vld [vmem:[%s3530_s3 + $0x330] sm:$0xff] }
  0xf7   : > { %v673_v33 = vadd.f32 %v2768_v57, %v589_v38  ;;  %v2127_v57 = vld [vmem:[%s3530_s3 + $0x2c8] sm:$0xff] }
  0xf9   : > { %v756_v1 = vadd.f32 %v2883_v34, %v673_v33  ;;  %v2125_v34 = vld [vmem:[%s3530_s3 + $0x2b8] sm:$0xff] }
  0xfa   : > { %v742_v23 = vpop.f32.mrf.mxu1 }
  0xfd   : > { %v2813_v39 = vpop.f32.mrf.mxu3 }
  0xfe   : > { %v2815_v40 = vpop.f32.mrf.mxu0 }
 0x102   : > { %v745_v24 = vpop.f32.mrf.mxu1 }
 0x105   : > { %v2868_v25 = vpop.f32.mrf.mxu3 }
 0x106   : > { %v2871_v26 = vpop.f32.mrf.mxu0 }
 0x107   : > { %v675_v53 = vadd.f32 %v2871_v26, %v591_v10  ;;  %v2129_v26 = vld [vmem:[%s3530_s3 + $0x2d8] sm:$0xff] }
 0x108   : > { %1444 = vmatpush.msrb.mxu2 %v2129_v26  ;;  %v840_v26 = vadd.f32 %v2904_v52, %v756_v1  ;;  %v510_v52 = vadd.f32 %v2615_v62, %v426_v49 }
 0x109   : > { %v758_v51 = vadd.f32 %v742_v23, %v675_v53 }
 0x10a   : > { %1445 = vmatpush.msrb.mxu2 %v2128_v17  ;;  %v748_v53 = vpop.f32.mrf.mxu1 }
 0x10b   : > { %v842_v22 = vadd.f32 %v826_v56, %v758_v51  ;;  %v590_v56 = vadd.f32 %v2653_v11, %v506_v54  ;;  %v2124_v51 = vld [vmem:[%s3530_s3 + $0x2b0] sm:$0xff] }
 0x10c   : > { %1446 = vmatpush.msrb.mxu2 %v2127_v57  ;;  %v2163_v57 = vld [vmem:[%s3530_s3 + $0x3e8] sm:$0xff] }
 0x10d   : > { %v2914_v9 = vpop.f32.mrf.mxu3  ;;  %v674_v16 = vadd.f32 %v2815_v40, %v590_v56 }
 0x10e   : > { %v2918_v19 = vpop.f32.mrf.mxu0  ;;  %v926_v13 = vadd.f32 %v2914_v9, %v842_v22  ;;  %v2126_v9 = vld [vmem:[%s3530_s3 + $0x2c0] sm:$0xff]  ;;  %v2108_v22 = vld [vmem:[%s3530_s3 + $0x230] sm:$0xff] }
 0x10f   : > { %v676_v23 = vadd.f32 %v2918_v19, %v592_v43  ;;  %v923_v19 = vadd.f32 %v2766_v55, %v839_v30  ;;  %1447 = vmatpush.msrb.mxu2 %v2126_v9  ;;  %v2146_v43 = vld [vmem:[%s3530_s3 + $0x360] sm:$0xff]  ;;  %v757_v38 = vadd.f32 %v2931_v31, %v674_v16  ;;  %v2145_v31 = vld [vmem:[%s3530_s3 + $0x358] sm:$0xff]  ;;  %1375 = vmatpush.msrb.mxu1 %v2108_v22  ;;  %v2164_v30 = vld [vmem:[%s3530_s3 + $0x3f0] sm:$0xff] }
 0x110   : > { %1518 = vmatpush.msrb.mxu3 %v2146_v43  ;;  %v2138_v22 = vld [vmem:[%s3530_s3 + $0x320] sm:$0xff] }
 0x111   : > { %v759_v12 = vadd.f32 %v745_v24, %v676_v23  ;;  %1448 = vmatpush.msrb.mxu2 %v2125_v34  ;;  %1376 = vmatpush.msrb.mxu1 %v2107_v3  ;;  %v2135_v3 = vld [vmem:[%s3530_s3 + $0x308] sm:$0xff] }
 0x112   : > { %v751_v32 = vpop.f32.mrf.mxu1  ;;  %1519 = vmatpush.msrb.mxu3 %v2145_v31 }
 0x113   : > { %v843_v5 = vadd.f32 %v829_v59, %v759_v12  ;;  %1449 = vmatpush.msrb.mxu2 %v2124_v51  ;;  %v841_v12 = vadd.f32 %v2944_v45, %v757_v38  ;;  %v2143_v45 = vld [vmem:[%s3530_s3 + $0x348] sm:$0xff]  ;;  %v2120_v51 = vld [vmem:[%s3530_s3 + $0x290] sm:$0xff]  ;;  %v2158_v38 = vld [vmem:[%s3530_s3 + $0x3c0] sm:$0xff] }
 0x114   : > { %1520 = vmatpush.msrb.mxu3 %v2144_v20  ;;  %v2181_v20 = vld [vmem:[%s3530_s3 + $0x478] sm:$0xff] }
 0x115   : > { %v2946_v46 = vpop.f32.mrf.mxu3 }
 0x116   : > { %v2954_v50 = vpop.f32.mrf.mxu0  ;;  %v927_v40 = vadd.f32 %v2946_v46, %v843_v5  ;;  %v594_v46 = vadd.f32 %v2716_v36, %v510_v52  ;;  %v2165_v36 = vld [vmem:[%s3530_s3 + $0x3f8] sm:$0xff]  ;;  %1521 = vmatpush.msrb.mxu3 %v2143_v45  ;;  %v2152_v45 = vld [vmem:[%s3530_s3 + $0x390] sm:$0xff] }
 0x117   : > { %v677_v14 = vadd.f32 %v2954_v50, %v593_v27  ;;  %1589 = vmatpush.msrb.mxu0 %v2165_v36  ;;  %v2162_v27 = vld [vmem:[%s3530_s3 + $0x3e0] sm:$0xff] }
 0x119   : > { %v760_v24 = vadd.f32 %v748_v53, %v677_v14  ;;  %1590 = vmatpush.msrb.mxu0 %v2164_v30  ;;  %v2121_v53 = vld [vmem:[%s3530_s3 + $0x298] sm:$0xff]  ;;  %v2156_v30 = vld [vmem:[%s3530_s3 + $0x3b0] sm:$0xff] }
 0x11a   : > { %v2141_v14 = vld [vmem:[%s3530_s3 + $0x338] sm:$0xff] }
 0x11b   : > { %1591 = vmatpush.msrb.mxu0 %v2163_v57  ;;  %v2153_v57 = vld [vmem:[%s3530_s3 + $0x398] sm:$0xff] }
 0x11d   : > { %v2971_v29 = vpop.f32.mrf.mxu3  ;;  %1592 = vmatpush.msrb.mxu0 %v2162_v27  ;;  %v2151_v27 = vld [vmem:[%s3530_s3 + $0x388] sm:$0xff] }
 0x11e   : > { %v2980_v35 = vpop.f32.mrf.mxu0 }
 0x11f   : > { %v678_v59 = vadd.f32 %v2980_v35, %v594_v46  ;;  %v2118_v46 = vld [vmem:[%s3530_s3 + $0x280] sm:$0xff] }
 0x125   : > { %v3000_v60 = vpop.f32.mrf.mxu3 }
 0x126   : > { %v981_v48 = vpop.f32.mrf.mxu0 }
 0x127   : > { %v1005_v61 = vadd.f32 %v981_v48, %v922_v44  ;;  %v832_v44 = vpop.f32.mrf.mxu2  ;;  %v924_v48 = vadd.f32 %v2813_v39, %v840_v26  ;;  %v2123_v39 = vld [vmem:[%s3530_s3 + $0x2a8] sm:$0xff]  ;;  %v2104_v26 = vld [vmem:[%s3530_s3 + $0x210] sm:$0xff] }
 0x128   : > { %v844_v33 = vadd.f32 %v832_v44, %v760_v24  ;;  %1450 = vmatpush.msrb.mxu2 %v2123_v39  ;;  %v2159_v24 = vld [vmem:[%s3530_s3 + $0x3c8] sm:$0xff]  ;;  %v2157_v39 = vld [vmem:[%s3530_s3 + $0x3b8] sm:$0xff] }
 0x129   : > { %v1017_v0 = vadd.f32 %v3005_v63, %v1005_v61 }
 0x12a   : > { %v928_v1 = vadd.f32 %v2971_v29, %v844_v33  ;;  %v2106_v29 = vld [vmem:[%s3530_s3 + $0x220] sm:$0xff]  ;;  %v2136_v33 = vld [vmem:[%s3530_s3 + $0x310] sm:$0xff] }
 0x12b   : > { %v3023_v7 = vmax.f32 %v1017_v0, 0.0  ;;  %1377 = vmatpush.msrb.mxu1 %v2106_v29  ;;  %v2178_v29 = vld [vmem:[%s3530_s3 + $0x460] sm:$0xff] }
 0x12d   : > { %1054 = vst [vmem:[#allocation2 + $0x11] sm:$0xff] %v3023_v7  ;;  %v993_v58 = vpop.f32.mrf.mxu3  ;;  %1130 = vmatmul.f32.gmra.mxu1 %v3023_v7 }
 0x12e   : > { %v1009_v10 = vadd.f32 %v993_v58, %v926_v13  ;;  %v984_v55 = vpop.f32.mrf.mxu0  ;;  %v2122_v13 = vld [vmem:[%s3530_s3 + $0x2a0] sm:$0xff]  ;;  %v761_v58 = vadd.f32 %v751_v32, %v678_v59  ;;  %1378 = vmatpush.msrb.mxu1 %v2105_v41  ;;  %v2155_v59 = vld [vmem:[%s3530_s3 + $0x3a8] sm:$0xff]  ;;  %v2173_v41 = vld [vmem:[%s3530_s3 + $0x438] sm:$0xff] }
 0x12f   : > { %v1006_v21 = vadd.f32 %v984_v55, %v923_v19  ;;  %1451 = vmatpush.msrb.mxu2 %v2122_v13  ;;  %v835_v55 = vpop.f32.mrf.mxu2  ;;  %v2154_v13 = vld [vmem:[%s3530_s3 + $0x3a0] sm:$0xff] }
 0x130   : > { %v1021_v11 = vadd.f32 %v3005_v63, %v1009_v10  ;;  %v925_v10 = vadd.f32 %v2868_v25, %v841_v12  ;;  %v2142_v25 = vld [vmem:[%s3530_s3 + $0x340] sm:$0xff]  ;;  %v845_v49 = vadd.f32 %v835_v55, %v761_v58  ;;  %1379 = vmatpush.msrb.mxu1 %v2104_v26  ;;  %v2179_v58 = vld [vmem:[%s3530_s3 + $0x468] sm:$0xff] }
 0x131   : > { %v1018_v15 = vadd.f32 %v3005_v63, %v1006_v21  ;;  %v2161_v21 = vld [vmem:[%s3530_s3 + $0x3d8] sm:$0xff]  ;;  %1452 = vmatpush.msrb.mxu2 %v2121_v53  ;;  %1522 = vmatpush.msrb.mxu3 %v2142_v25  ;;  %v2176_v53 = vld [vmem:[%s3530_s3 + $0x450] sm:$0xff] }
 0x132   : > { %v3074_v50 = vmax.f32 %v1021_v11, 0.0  ;;  %v2160_v11 = vld [vmem:[%s3530_s3 + $0x3d0] sm:$0xff]  ;;  %1593 = vmatpush.msrb.mxu0 %v2161_v21  ;;  %v929_v44 = vadd.f32 %v3000_v60, %v845_v49  ;;  %v2103_v60 = vld [vmem:[%s3530_s3 + $0x208] sm:$0xff]  ;;  %v2170_v49 = vld [vmem:[%s3530_s3 + $0x420] sm:$0xff] }
 0x133   : > { %v3076_v8 = vmax.f32 %v1018_v15, 0.0  ;;  %1453 = vmatpush.msrb.mxu2 %v2120_v51  ;;  %1523 = vmatpush.msrb.mxu3 %v2141_v14  ;;  %v2175_v21 = vld [vmem:[%s3530_s3 + $0x448] sm:$0xff] }
 0x134   : > { %1058 = vst [vmem:[#allocation2 + $0x51] sm:$0xff] %v3074_v50  ;;  %v1063_v4 = vld [vmem:[#allocation2 + $0x10] sm:$0xff]  ;;  %1594 = vmatpush.msrb.mxu0 %v2160_v11  ;;  %1380 = vmatpush.msrb.mxu1 %v2103_v60  ;;  %v2167_v14 = vld [vmem:[%s3530_s3 + $0x408] sm:$0xff] }
 0x135   : > { %v3081_v17 = vld [vmem:[#allocation2 + $0x12] sm:$0xff]  ;;  %1055 = vst [vmem:[#allocation2 + $0x21] sm:$0xff] %v3076_v8  ;;  %v996_v62 = vpop.f32.mrf.mxu3  ;;  %1171 = vmatmul.f32.gmra.mxu2 %v1063_v4  ;;  %1308 = vmatmul.f32.vlgmr.msra.gmra.mxu0 %v1063_v4 }
 0x136   : > { %1237 = vmatmul.f32.gmra.mxu3 %v3081_v17  ;;  %v1010_v61 = vadd.f32 %v996_v62, %v927_v40  ;;  %v987_v18 = vpop.f32.mrf.mxu0  ;;  %1133 = vmatmul.f32.gmra.mxu1 %v3076_v8  ;;  %v2119_v62 = vld [vmem:[%s3530_s3 + $0x288] sm:$0xff] }
 0x137   : > { %v1007_v23 = vadd.f32 %v987_v18, %v924_v48  ;;  %v2139_v48 = vld [vmem:[%s3530_s3 + $0x328] sm:$0xff]  ;;  %1524 = vmatpush.msrb.mxu3 %v2140_v42  ;;  %1595 = vmatpush.msrb.mxu0 %v2159_v24 }
 0x138   : > { %v1022_v0 = vadd.f32 %v3005_v63, %v1010_v61  ;;  %v2102_v61 = vld [vmem:[%s3530_s3 + $0x200] sm:$0xff]  ;;  %1454 = vmatpush.msrb.mxu2 %v2119_v62  ;;  %v2186_v62 = vld [vmem:[%s2425_s8 + $0x1f0] sm:$0xff] }
 0x139   : > { %v1019_v35 = vadd.f32 %v3005_v63, %v1007_v23  ;;  %1525 = vmatpush.msrb.mxu3 %v2139_v48  ;;  %1596 = vmatpush.msrb.mxu0 %v2158_v38 }
 0x13a   : > { %v3123_v54 = vmax.f32 %v1022_v0, 0.0  ;;  %1455 = vmatpush.msrb.mxu2 %v2118_v46  ;;  %1381 = vmatpush.msrb.mxu1 %v2102_v61  ;;  %v1720_v0 = vld [vmem:[%s3532_s5] sm:$0xff] }
 0x13b   : > { %v3125_v19 = vmax.f32 %v1019_v35, 0.0  ;;  %1526 = vmatpush.msrb.mxu3 %v2138_v22  ;;  %1597 = vmatpush.msrb.mxu0 %v2157_v39  ;;  %v3255_v12 = vld [vmem:[#allocation2 + $0x50] sm:$0xff]  ;;  %v2134_v35 = vld [vmem:[%s3530_s3 + $0x300] sm:$0xff] }
 0x13c   : > { %1059 = vst [vmem:[#allocation2 + $0x61] sm:$0xff] %v3123_v54  ;;  %v3132_v6 = vld [vmem:[#allocation2 + $0x20] sm:$0xff]  ;;  %1760 = vmatpush.msra.mxu2 %v1720_v0  ;;  %1663 = vmatpush.msra.mxu1 %v2181_v20  ;;  %v3257_v32 = vld [vmem:[#allocation2 + $0x52] sm:$0xff] }
 0x13d   : > { %v3134_v9 = vld [vmem:[#allocation2 + $0x22] sm:$0xff]  ;;  %1056 = vst [vmem:[#allocation2 + $0x31] sm:$0xff] %v3125_v19  ;;  %v999_v34 = vpop.f32.mrf.mxu3  ;;  %1174 = vmatmul.f32.gmra.mxu2 %v3132_v6  ;;  %1311 = vmatmul.f32.gmra.mxu0 %v3132_v6  ;;  %v1645_v0 = vld [vmem:[#allocation2 + $0x92] sm:$0xff] }
 0x13e   : > { %1240 = vmatmul.f32.gmra.mxu3 %v3134_v9  ;;  %v1011_v37 = vadd.f32 %v999_v34, %v928_v1  ;;  %v990_v56 = vpop.f32.mrf.mxu0  ;;  %1136 = vmatmul.f32.gmra.mxu1 %v3125_v19  ;;  %v2180_v1 = vld [vmem:[%s3530_s3 + $0x470] sm:$0xff]  ;;  %v2150_v34 = vld [vmem:[%s3530_s3 + $0x380] sm:$0xff] }
 0x13f   : > { %v1008_v28 = vadd.f32 %v990_v56, %v925_v10  ;;  %1598 = vmatpush.msrb.mxu0 %v2156_v30  ;;  %1664 = vmatpush.msra.mxu1 %v2180_v1  ;;  %v2187_v39 = vld [vmem:[%s2425_s8 + $0x200] sm:$0xff] }
 0x140   : > { %v1023_v5 = vadd.f32 %v3005_v63, %v1011_v37  ;;  %v2177_v37 = vld [vmem:[%s3530_s3 + $0x458] sm:$0xff] }
 0x141   : > { %v1020_v2 = vadd.f32 %v3005_v63, %v1008_v28  ;;  %1599 = vmatpush.msrb.mxu0 %v2155_v59  ;;  %1665 = vmatpush.msra.mxu1 %v2179_v58 }
 0x142   : > { %v3174_v16 = vmax.f32 %v1023_v5, 0.0  ;;  %v2168_v5 = vld [vmem:[%s3530_s3 + $0x410] sm:$0xff] }
 0x143   : > { %v3176_v15 = vmax.f32 %v1020_v2, 0.0  ;;  %1600 = vmatpush.msrb.mxu0 %v2154_v13  ;;  %v1068_v10 = vld [vmem:[#allocation2 + $0x60] sm:$0xff]  ;;  %1666 = vmatpush.msra.mxu1 %v2178_v29 }
 0x144   : > { %1060 = vst [vmem:[#allocation2 + $0x71] sm:$0xff] %v3174_v16  ;;  %v3183_v52 = vld [vmem:[#allocation2 + $0x30] sm:$0xff]  ;;  %v3281_v55 = vld [vmem:[#allocation2 + $0x62] sm:$0xff] }
 0x145   : > { %v3185_v40 = vld [vmem:[#allocation2 + $0x32] sm:$0xff]  ;;  %1057 = vst [vmem:[#allocation2 + $0x41] sm:$0xff] %v3176_v15  ;;  %v1002_v4 = vpop.f32.mrf.mxu3  ;;  %1177 = vmatmul.f32.gmra.mxu2 %v3183_v52  ;;  %1314 = vmatmul.f32.gmra.mxu0 %v3183_v52 }
 0x146   : > { %1243 = vmatmul.f32.gmra.mxu3 %v3185_v40  ;;  %v1012_v43 = vadd.f32 %v1002_v4, %v929_v44  ;;  %1139 = vmatmul.f32.gmra.mxu1 %v3176_v15 }
 0x147   : > { %1601 = vmatpush.msrb.mxu0 %v2153_v57  ;;  %1667 = vmatpush.msra.mxu1 %v2177_v37 }
 0x148   : > { %v1024_v18 = vadd.f32 %v3005_v63, %v1012_v43  ;;  %v2137_v63 = vld [vmem:[%s3530_s3 + $0x318] sm:$0xff] }
 0x149   : > { %1527 = vmatpush.msrb.mxu3 %v2137_v63  ;;  %1602 = vmatpush.msrb.mxu0 %v2152_v45 }
 0x14a   : > { %v3220_v31 = vmax.f32 %v1024_v18, 0.0  ;;  %1668 = vmatpush.msra.mxu1 %v2176_v53 }
 0x14b   : > { %1528 = vmatpush.msrb.mxu3 %v2136_v33  ;;  %1603 = vmatpush.msrb.mxu0 %v2151_v27  ;;  %v1069_v56 = vld [vmem:[#allocation2 + $0x70] sm:$0xff] }
 0x14c   : > { %1061 = vst [vmem:[#allocation2 + $0x81] sm:$0xff] %v3220_v31  ;;  %v3226_v23 = vld [vmem:[#allocation2 + $0x40] sm:$0xff]  ;;  %v3294_v25 = vld [vmem:[#allocation2 + $0x72] sm:$0xff]  ;;  %1669 = vmatpush.msra.mxu1 %v2175_v21 }
 0x14d   : > { %v3228_v36 = vld [vmem:[#allocation2 + $0x42] sm:$0xff]  ;;  %1180 = vmatmul.f32.gmra.mxu2 %v3226_v23  ;;  %1317 = vmatmul.f32.gmra.mxu0 %v3226_v23  ;;  %v2188_v33 = vld [vmem:[%s2425_s8 + $0x210] sm:$0xff] }
 0x14e   : > { %1246 = vmatmul.f32.gmra.mxu3 %v3228_v36  ;;  %1142 = vmatmul.f32.gmra.mxu1 %v3074_v50 }
 0x14f   : > { %1529 = vmatpush.msrb.mxu3 %v2135_v3  ;;  %1604 = vmatpush.msrb.mxu0 %v2150_v34 }
 0x151   : > { %1530 = vmatpush.msrb.mxu3 %v2134_v35 }
 0x153   : > { %v1274_v28 = vld [vmem:[#allocation2 + $0x80] sm:$0xff] }
 0x155   : > { %1183 = vmatmul.f32.gmra.mxu2 %v3255_v12  ;;  %1320 = vmatmul.f32.gmra.mxu0 %v3255_v12 }
 0x156   : > { %1249 = vmatmul.f32.gmra.mxu3 %v3257_v32  ;;  %1145 = vmatmul.f32.gmra.mxu1 %v3123_v54 }
 0x15c   : > { %v1128_v11 = vpop.f32.mrf.mxu1 }
 0x15d   : > { %1186 = vmatmul.f32.gmra.mxu2 %v1068_v10  ;;  %1323 = vmatmul.f32.gmra.mxu0 %v1068_v10  ;;  %v1169_v51 = vpop.f32.mrf.mxu2 }
 0x15e   : > { %1252 = vmatmul.f32.gmra.mxu3 %v3281_v55  ;;  %1148 = vmatmul.f32.gmra.mxu1 %v3174_v16  ;;  %v3349_v2 = vadd.f32 %v1169_v51, %v1128_v11 }
 0x161   : > { %v1235_v38 = vpop.f32.mrf.mxu3 }
 0x165   : > { %1189 = vmatmul.f32.gmra.mxu2 %v1069_v56  ;;  %1326 = vmatmul.f32.gmra.mxu0 %v1069_v56 }
 0x166   : > { %1255 = vmatmul.f32.gmra.mxu3 %v3294_v25  ;;  %1382 = vmatmul.f32.vlgmr.msrb.gmra.mxu1 %v3023_v7  ;;  %v2174_v7 = vld [vmem:[%s3530_s3 + $0x440] sm:$0xff] }
 0x167   : > { %1670 = vmatpush.msra.mxu1 %v2174_v7 }
 0x169   : > { %1671 = vmatpush.msra.mxu1 %v2173_v41 }
 0x16d   : > { %1456 = vmatmul.f32.vlgmr.msrb.gmra.mxu2 %v3081_v17  ;;  %1329 = vmatmul.f32.gmra.mxu0 %v1274_v28  ;;  %v2172_v17 = vld [vmem:[%s3530_s3 + $0x430] sm:$0xff] }
 0x16e   : > { %1531 = vmatmul.f32.vlgmr.msrb.gmra.mxu3 %v3132_v6  ;;  %1385 = vmatmul.f32.gmra.mxu1 %v3076_v8  ;;  %v2171_v6 = vld [vmem:[%s3530_s3 + $0x428] sm:$0xff] }
 0x16f   : > { %1672 = vmatpush.msra.mxu1 %v2172_v17 }
 0x171   : > { %1673 = vmatpush.msra.mxu1 %v2171_v6 }
 0x173   : > { %1674 = vmatpush.msra.mxu1 %v2170_v49 }
 0x175   : > { %1459 = vmatmul.f32.gmra.mxu2 %v3134_v9  ;;  %1605 = vmatmul.f32.vlgmr.msrb.gmra.mxu0 %v3076_v8  ;;  %v2169_v8 = vld [vmem:[%s3530_s3 + $0x418] sm:$0xff] }
 0x176   : > { %1534 = vmatmul.f32.gmra.mxu3 %v3183_v52  ;;  %1388 = vmatmul.f32.gmra.mxu1 %v3125_v19 }
 0x177   : > { %1675 = vmatpush.msra.mxu1 %v2169_v8 }
 0x179   : > { %1676 = vmatpush.msra.mxu1 %v2168_v5 }
 0x17b   : > { %1677 = vmatpush.msra.mxu1 %v2167_v14 }
 0x17d   : > { %1462 = vmatmul.f32.gmra.mxu2 %v3185_v40  ;;  %1608 = vmatmul.f32.gmra.mxu0 %v3125_v19  ;;  %v2166_v19 = vld [vmem:[%s3530_s3 + $0x400] sm:$0xff] }
 0x17e   : > { %1537 = vmatmul.f32.gmra.mxu3 %v3226_v23  ;;  %1391 = vmatmul.f32.gmra.mxu1 %v3176_v15 }
 0x17f   : > { %1678 = vmatpush.msra.mxu1 %v2166_v19 }
 0x185   : > { %1465 = vmatmul.f32.gmra.mxu2 %v3228_v36  ;;  %1611 = vmatmul.f32.gmra.mxu0 %v3176_v15  ;;  %v1571_v15 = vld [vmem:[#allocation2 + $0x91] sm:$0xff] }
 0x186   : > { %1540 = vmatmul.f32.gmra.mxu3 %v3255_v12  ;;  %1394 = vmatmul.f32.gmra.mxu1 %v3074_v50 }
 0x18d   : > { %1468 = vmatmul.f32.gmra.mxu2 %v3257_v32  ;;  %1614 = vmatmul.f32.gmra.mxu0 %v3074_v50  ;;  %v1422_v50 = vld [vmem:[#allocation2 + $0x82] sm:$0xff] }
 0x18e   : > { %1543 = vmatmul.f32.gmra.mxu3 %v1068_v10  ;;  %1397 = vmatmul.f32.gmra.mxu1 %v3123_v54 }
 0x195   : > { %1471 = vmatmul.f32.gmra.mxu2 %v3281_v55  ;;  %1617 = vmatmul.f32.gmra.mxu0 %v3123_v54  ;;  %v2182_v54 = vld [vmem:[%s2425_s8 + $0x1b0] sm:$0xff] }
 0x196   : > { %1546 = vmatmul.f32.gmra.mxu3 %v1069_v56  ;;  %1400 = vmatmul.f32.gmra.mxu1 %v3174_v16 }
 0x19d   : > { %1474 = vmatmul.f32.gmra.mxu2 %v3294_v25  ;;  %1620 = vmatmul.f32.gmra.mxu0 %v3174_v16  ;;  %v2183_v16 = vld [vmem:[%s2425_s8 + $0x1c0] sm:$0xff] }
 0x19e   : > { %1549 = vmatmul.f32.gmra.mxu3 %v1274_v28  ;;  %1403 = vmatmul.f32.gmra.mxu1 %v3220_v31 }
 0x1a5   : > { %1477 = vmatmul.f32.gmra.mxu2 %v1422_v50  ;;  %1623 = vmatmul.f32.gmra.mxu0 %v3220_v31 }
 0x1a6   : > { %1552 = vmatmul.f32.gmra.mxu3 %v2317_v47  ;;  %1679 = vmatmul.f32.vlgmr.msra.gmra.mxu1 %v3134_v9  ;;  %v2184_v9 = vld [vmem:[%s2425_s8 + $0x1d0] sm:$0xff] }
 0x1aa   : > { %v1131_v26 = vpop.f32.mrf.mxu1 }
 0x1ad   : > { %2190 = vmatmul.msk.f32.vlgmr.msra.gmra.mxu2 %vm297_vm0, %v2182_v54  ;;  %1626 = vmatmul.f32.gmra.mxu0 %v1571_v15 }
 0x1ae   : > { %1682 = vmatmul.f32.gmra.mxu1 %v3185_v40  ;;  %v2185_v40 = vld [vmem:[%s2425_s8 + $0x1e0] sm:$0xff] }
 0x1b2   : > { %v1309_v61 = vpop.f32.mrf.mxu0 }
 0x1b3   : > { %v1134_v42 = vpop.f32.mrf.mxu1 }
 0x1b5   : > { %2191 = vmatmul.msk.f32.gmra.mxu2 %vm297_vm0, %v2183_v16 }
 0x1b6   : > { %1685 = vmatmul.f32.gmra.mxu1 %v3228_v36 }
 0x1b8   : > { %v1172_v47 = vpop.f32.mrf.mxu2 }
 0x1b9   : > { %v3366_v44 = vadd.f32 %v1172_v47, %v1131_v26  ;;  %v1238_v63 = vpop.f32.mrf.mxu3 }
 0x1ba   : > { %v1312_v23 = vpop.f32.mrf.mxu0 }
 0x1bb   : > { %v1137_v52 = vpop.f32.mrf.mxu1 }
 0x1bd   : > { %2192 = vmatmul.msk.f32.gmra.mxu2 %vm297_vm0, %v2184_v9  ;;  %v1260_v9 = vadd.f32 %v1238_v63, %v3366_v44 }
 0x1be   : > { %1688 = vmatmul.f32.gmra.mxu1 %v3257_v32  ;;  %v2189_v32 = vld [vmem:[%s2425_s8 + $0x220] sm:$0xff]  ;;  %s2269_s8 = scalar_lea.hbm %s2268_s14, 64 }
 0x1bf   : > { %p2270_p11 = scmp.ne.s32.totalorder %s2268_s14, %s2269_s8  ;;  %p2275_p1 = scmp.lt.s32.totalorder %s2273_s18, %s2269_s8 }
 0x1c0   : > { %v1175_v24 = vpop.f32.mrf.mxu2 }
 0x1c1   : > { %v3371_v4 = vadd.f32 %v1175_v24, %v1134_v42  ;;  %v1241_v20 = vpop.f32.mrf.mxu3  ;;  %p2271_p12 = pnand %p2270_p11, %p2398_p5  ;;  %p2276_p2 = por %p2275_p1, %p2274_p0 }
 0x1c2   : > { %v1315_v13 = vpop.f32.mrf.mxu0 }
 0x1c3   : > { %v1140_v60 = vpop.f32.mrf.mxu1  ;;  %p2272_p13 = pneg %p2271_p12 }
 0x1c5   : > { %2193 = vmatmul.msk.f32.gmra.mxu2 %vm297_vm0, %v2185_v40  ;;  %p2277_p3 = pnand %p2276_p2, %p2272_p13 }
 0x1c6   : > { %1691 = vmatmul.f32.gmra.mxu1 %v3281_v55 }
 0x1c8   : > { %v1178_v43 = vpop.f32.mrf.mxu2 }
 0x1c9   : > { %v3376_v48 = vadd.f32 %v1178_v43, %v1137_v52  ;;  %v1244_v57 = vpop.f32.mrf.mxu3 }
 0x1ca   : > { %v3395_v58 = vpop.f32.mrf.mxu0 }
 0x1cb   : > { %v1143_v46 = vpop.f32.mrf.mxu1 }
 0x1cd   : > { %2194 = vmatmul.msk.f32.gmra.mxu2 %vm297_vm0, %v2186_v62 }
 0x1ce   : > { %1694 = vmatmul.f32.gmra.mxu1 %v3294_v25 }
 0x1d0   : > { %v1181_v18 = vpop.f32.mrf.mxu2 }
 0x1d1   : > { %v3381_v22 = vadd.f32 %v1181_v18, %v1140_v60  ;;  %v3397_v55 = vpop.f32.mrf.mxu3  ;;  %v1334_v60 = vadd.f32 %v1312_v23, %v1260_v9 }
 0x1d2   : > { %v3399_v29 = vpop.f32.mrf.mxu0 }
 0x1d3   : > { %v1146_v31 = vpop.f32.mrf.mxu1 }
 0x1d5   : > { %2195 = vmatmul.msk.f32.gmra.mxu2 %vm297_vm0, %v2187_v39 }
 0x1d6   : > { %1697 = vmatmul.f32.gmra.mxu1 %v1422_v50  ;;  %v1259_v50 = vadd.f32 %v1235_v38, %v3349_v2  ;;  %v1261_v2 = vadd.f32 %v1241_v20, %v3371_v4 }
 0x1d8   : > { %v1184_v36 = vpop.f32.mrf.mxu2  ;;  %v1333_v15 = vadd.f32 %v1309_v61, %v1259_v50  ;;  %v1335_v63 = vadd.f32 %v1315_v13, %v1261_v2 }
 0x1d9   : > { %v3385_v30 = vadd.f32 %v1184_v36, %v1143_v46  ;;  %v3401_v25 = vpop.f32.mrf.mxu3 }
 0x1da   : > { %v3403_v53 = vpop.f32.mrf.mxu0 }
 0x1db   : > { %v1149_v59 = vpop.f32.mrf.mxu1 }
 0x1dd   : > { %2196 = vmatmul.msk.f32.gmra.mxu2 %vm297_vm0, %v2188_v33 }
 0x1de   : > { %1700 = vmatmul.f32.gmra.mxu1 %v1645_v0 }
 0x1e0   : > { %v1187_v3 = vpop.f32.mrf.mxu2 }
 0x1e1   : > { %v3389_v12 = vadd.f32 %v1187_v3, %v1146_v31  ;;  %v3407_v7 = vpop.f32.mrf.mxu3  ;;  %v3435_v31 = vld [vmem:[%s3531_s4] ss:$0 sm:$0xff]  ;;  %v1262_v3 = vadd.f32 %v1244_v57, %v3376_v48 }
 0x1e2   : > { %v3409_v17 = vpop.f32.mrf.mxu0 }
 0x1e3   : > { %v1383_v35 = vpop.f32.mrf.mxu1 }
 0x1e4   : > { %v1407_v16 = vadd.f32 %v1383_v35, %v1333_v15 }
 0x1e5   : > { %2197 = vmatmul.msk.f32.gmra.mxu2 %vm297_vm0, %v2189_v32 }
 0x1e8   : > { %v1190_v45 = vpop.f32.mrf.mxu2 }
 0x1e9   : > { %v3393_v1 = vadd.f32 %v1190_v45, %v1149_v59  ;;  %v3413_v49 = vpop.f32.mrf.mxu3  ;;  %v3441_v59 = vld [vmem:[%s3533_s6] ss:$0 sm:$0xff] }
 0x1ea   : > { %v3417_v5 = vpop.f32.mrf.mxu0 }
 0x1eb   : > { %v1386_v27 = vpop.f32.mrf.mxu1 }
 0x1ec   : > { %v1408_v62 = vadd.f32 %v1386_v27, %v1334_v60 }
 0x1f0   : > { %v1457_v10 = vpop.f32.mrf.mxu2 }
 0x1f1   : > { %v1532_v11 = vpop.f32.mrf.mxu3  ;;  %v1481_v52 = vadd.f32 %v1457_v10, %v1407_v16 }
 0x1f2   : > { %v1606_v54 = vpop.f32.mrf.mxu0 }
 0x1f3   : > { %v1389_v34 = vpop.f32.mrf.mxu1  ;;  %v1556_v43 = vadd.f32 %v1532_v11, %v1481_v52  ;;  %v1336_v11 = vadd.f32 %v3395_v58, %v1262_v3 }
 0x1f4   : > { %v1409_v4 = vadd.f32 %v1389_v34, %v1335_v63 }
 0x1f5   : > { %v1630_v38 = vadd.f32 %v1606_v54, %v1556_v43 }
 0x1f8   : > { %v1460_v37 = vpop.f32.mrf.mxu2 }
 0x1f9   : > { %v1535_v47 = vpop.f32.mrf.mxu3  ;;  %v1482_v18 = vadd.f32 %v1460_v37, %v1408_v62 }
 0x1fa   : > { %v1609_v24 = vpop.f32.mrf.mxu0 }
 0x1fb   : > { %v1392_v56 = vpop.f32.mrf.mxu1  ;;  %v1557_v36 = vadd.f32 %v1535_v47, %v1482_v18 }
 0x1fc   : > { %v1410_v54 = vadd.f32 %v1392_v56, %v1336_v11 }
 0x1fd   : > { %v1631_v32 = vadd.f32 %v1609_v24, %v1557_v36 }
 0x200   : > { %v1463_v21 = vpop.f32.mrf.mxu2 }
 0x201   : > { %v1538_v61 = vpop.f32.mrf.mxu3  ;;  %v1483_v35 = vadd.f32 %v1463_v21, %v1409_v4  ;;  %v1263_v21 = vadd.f32 %v3397_v55, %v3381_v22  ;;  %v1264_v22 = vadd.f32 %v3401_v25, %v3385_v30 }
 0x202   : > { %v1612_v23 = vpop.f32.mrf.mxu0 }
 0x203   : > { %v3405_v28 = vpop.f32.mrf.mxu1  ;;  %v1558_v50 = vadd.f32 %v1538_v61, %v1483_v35  ;;  %v1337_v24 = vadd.f32 %v3399_v29, %v1263_v21 }
 0x205   : > { %v1632_v16 = vadd.f32 %v1612_v23, %v1558_v50  ;;  %v1411_v62 = vadd.f32 %v3405_v28, %v1337_v24 }
 0x208   : > { %v1466_v41 = vpop.f32.mrf.mxu2 }
 0x209   : > { %v1541_v10 = vpop.f32.mrf.mxu3 }
 0x20a   : > { %v1615_v15 = vpop.f32.mrf.mxu0 }
 0x20b   : > { %v3411_v6 = vpop.f32.mrf.mxu1 }
 0x210   : > { %v3415_v8 = vpop.f32.mrf.mxu2 }
 0x211   : > { %v1544_v43 = vpop.f32.mrf.mxu3 }
 0x212   : > { %v1618_v2 = vpop.f32.mrf.mxu0 }
 0x213   : > { %v3419_v14 = vpop.f32.mrf.mxu1 }
 0x218   : > { %v3421_v19 = vpop.f32.mrf.mxu2 }
 0x219   : > { %v1547_v25 = vpop.f32.mrf.mxu3 }
 0x21b   : > { %v3423_v51 = vpop.f32.mrf.mxu1 }
 0x220   : > { %v3426_v26 = vpop.f32.mrf.mxu2 }
 0x223   : > { %v1680_v42 = vpop.f32.mrf.mxu1 }
 0x224   : > { %v1704_v39 = vadd.f32 %v1680_v42, %v1630_v38  ;;  %v1484_v42 = vadd.f32 %v1466_v41, %v1410_v54  ;;  %v1485_v41 = vadd.f32 %v3415_v8, %v1411_v62  ;;  %v1265_v8 = vadd.f32 %v3407_v7, %v3389_v12 }
 0x225   : > { %v1266_v7 = vadd.f32 %v3413_v49, %v3393_v1 }
 0x226   : > { %v1559_v60 = vadd.f32 %v1541_v10, %v1484_v42  ;;  %v1560_v63 = vadd.f32 %v1544_v43, %v1485_v41  ;;  %v1339_v35 = vadd.f32 %v3409_v17, %v1265_v8 }
 0x228   : > { %v3429_v40 = vpop.f32.mrf.mxu2  ;;  %v1633_v55 = vadd.f32 %v1615_v15, %v1559_v60  ;;  %v1634_v23 = vadd.f32 %v1618_v2, %v1560_v63 }
 0x22b   : > { %v1683_v46 = vpop.f32.mrf.mxu1 }
 0x22c   : > { %v1705_v27 = vadd.f32 %v1683_v46, %v1631_v32 }
 0x230   : > { %v1762_v44 = vpop.f32.mrf.mxu2 }
 0x231   : > { %v1786_v33 = vadd.f32 %v1762_v44, %v1704_v39  ;;  %v1338_v44 = vadd.f32 %v3403_v53, %v1264_v22 }
 0x233   : > { %v1798_v0 = vadd.f32 %v3435_v31, %v1786_v33  ;;  %v1686_v20 = vpop.f32.mrf.mxu1  ;;  %v1412_v36 = vadd.f32 %v3411_v6, %v1338_v44 }
 0x234   : > { %v1706_v9 = vadd.f32 %v1686_v20, %v1632_v16 }
 0x235   : > { %v1810_v13 = vadd.f32 %v3441_v59, %v1798_v0  ;;  %v1486_v33 = vadd.f32 %v3421_v19, %v1412_v36  ;;  %v1621_v0 = vpop.f32.mrf.mxu0 }
 0x237   : > { %v1818_v45 = vmax.f32 %v1810_v13, 0.0  ;;  %v1561_v6 = vadd.f32 %v1547_v25, %v1486_v33 }
 0x238   : > { %v1765_v37 = vpop.f32.mrf.mxu2 }
 0x239   : > { %1826 = vst [vmem:[%s3449_s20] sm:$0xff] %v1818_v45  ;;  %v1787_v34 = vadd.f32 %v1765_v37, %v1705_v27  ;;  %v1413_v45 = vadd.f32 %v3419_v14, %v1339_v35  ;;  %v1635_v19 = vadd.f32 %v1621_v0, %v1561_v6  ;;  %v1550_v37 = vpop.f32.mrf.mxu3 }
 0x23b   : > { %v1799_v48 = vadd.f32 %v3435_v31, %v1787_v34  ;;  %v1689_v57 = vpop.f32.mrf.mxu1  ;;  %v1487_v27 = vadd.f32 %v3426_v26, %v1413_v45  ;;  %v1340_v34 = vadd.f32 %v3417_v5, %v1266_v7 }
 0x23c   : > { %v1707_v61 = vadd.f32 %v1689_v57, %v1633_v55 }
 0x23d   : > { %v1811_v47 = vadd.f32 %v3441_v59, %v1799_v48  ;;  %v1562_v54 = vadd.f32 %v1550_v37, %v1487_v27  ;;  %v1624_v15 = vpop.f32.mrf.mxu0  ;;  %v1414_v57 = vadd.f32 %v3423_v51, %v1340_v34 }
 0x23f   : > { %v1819_v58 = vmax.f32 %v1811_v47, 0.0  ;;  %v1636_v49 = vadd.f32 %v1624_v15, %v1562_v54  ;;  %v1488_v26 = vadd.f32 %v3429_v40, %v1414_v57 }
 0x240   : > { %v1768_v52 = vpop.f32.mrf.mxu2 }
 0x241   : > { %1827 = vst [vmem:[%s3449_s20 + $0x8] sm:$0xff] %v1819_v58  ;;  %v1788_v56 = vadd.f32 %v1768_v52, %v1706_v9  ;;  %v1553_v16 = vpop.f32.mrf.mxu3 }
 0x242   : > { %v1563_v58 = vadd.f32 %v1553_v16, %v1488_v26 }
 0x243   : > { %v1800_v46 = vadd.f32 %v3435_v31, %v1788_v56  ;;  %v1692_v18 = vpop.f32.mrf.mxu1 }
 0x244   : > { %v1708_v53 = vadd.f32 %v1692_v18, %v1634_v23 }
 0x245   : > { %v1812_v38 = vadd.f32 %v3441_v59, %v1800_v46  ;;  %v1627_v52 = vpop.f32.mrf.mxu0 }
 0x246   : > { %v1637_v60 = vadd.f32 %v1627_v52, %v1563_v58 }
 0x247   : > { %v1820_v29 = vmax.f32 %v1812_v38, 0.0 }
 0x248   : > { %v1771_v39 = vpop.f32.mrf.mxu2 }
 0x249   : > { %1828 = vst [vmem:[%s3449_s20 + $0x10] sm:$0xff] %v1820_v29  ;;  %v1789_v28 = vadd.f32 %v1771_v39, %v1707_v61 }
 0x24b   : > { %v1801_v30 = vadd.f32 %v3435_v31, %v1789_v28  ;;  %v1695_v32 = vpop.f32.mrf.mxu1 }
 0x24c   : > { %v1709_v50 = vadd.f32 %v1695_v32, %v1635_v19 }
 0x24d   : > { %v1813_v4 = vadd.f32 %v3441_v59, %v1801_v30 }
 0x24f   : > { %v1821_v20 = vmax.f32 %v1813_v4, 0.0 }
 0x250   : > { %v1774_v3 = vpop.f32.mrf.mxu2 }
 0x251   : > { %1829 = vst [vmem:[%s3449_s20 + $0x18] sm:$0xff] %v1821_v20  ;;  %v1790_v13 = vadd.f32 %v1774_v3, %v1708_v53 }
 0x253   : > { %v1802_v12 = vadd.f32 %v3435_v31, %v1790_v13  ;;  %v1698_v48 = vpop.f32.mrf.mxu1 }
 0x254   : > { %v1710_v5 = vadd.f32 %v1698_v48, %v1636_v49 }
 0x255   : > { %v1814_v10 = vadd.f32 %v3441_v59, %v1802_v12 }
 0x257   : > { %v1822_v11 = vmax.f32 %v1814_v10, 0.0 }
 0x258   : > { %v1777_v17 = vpop.f32.mrf.mxu2 }
 0x259   : > { %1830 = vst [vmem:[%s3449_s20 + $0x20] sm:$0xff] %v1822_v11  ;;  %v1791_v14 = vadd.f32 %v1777_v17, %v1709_v50 }
 0x25b   : > { %v1803_v1 = vadd.f32 %v3435_v31, %v1791_v14  ;;  %v1701_v24 = vpop.f32.mrf.mxu1 }
 0x25c   : > { %v1711_v43 = vadd.f32 %v1701_v24, %v1637_v60 }
 0x25d   : > { %v1815_v21 = vadd.f32 %v3441_v59, %v1803_v1 }
 0x25f   : > { %v1823_v42 = vmax.f32 %v1815_v21, 0.0 }
 0x260   : > { %v1780_v47 = vpop.f32.mrf.mxu2 }
 0x261   : > { %1831 = vst [vmem:[%s3449_s20 + $0x28] sm:$0xff] %v1823_v42  ;;  %v1792_v9 = vadd.f32 %v1780_v47, %v1710_v5 }
 0x263   : > { %v1804_v51 = vadd.f32 %v3435_v31, %v1792_v9 }
 0x265   : > { %v1816_v56 = vadd.f32 %v3441_v59, %v1804_v51 }
 0x267   : > { %v1824_v40 = vmax.f32 %v1816_v56, 0.0 }
 0x268   : > { %v1783_v62 = vpop.f32.mrf.mxu2 }
 0x269   : > { %1832 = vst [vmem:[%s3449_s20 + $0x30] sm:$0xff] %v1824_v40  ;;  %v1793_v46 = vadd.f32 %v1783_v62, %v1711_v43 }
 0x26b   : > { %v1805_v22 = vadd.f32 %v3435_v31, %v1793_v46 }
 0x26d   : > { %v1817_v55 = vadd.f32 %v3441_v59, %v1805_v22 }
 0x26f   : > { %v1825_v41 = vmax.f32 %v1817_v55, 0.0 }
 0x271   : > { %1833 = vst [vmem:[%s3449_s20 + $0x38] sm:$0xff] %v1825_v41 }
 0x272   : > { %2280 = shalt.err (!%p2277_p3)
}
 0x273   : > { %s2318_s16 = smov 128   ;;  %s2319_s20 = smov 8  }
 0x274   : > { %2208 = dma.vmem_to_hbm [thread:$0]  (%p2398_p5), %s1848_s9, 1024, %s1850_s13, %s1835_s28, %s2318_s16, %s2318_s16, %s2319_s20  }
 0x275 PF: > { %p2214_p4 = scmp.ge.s32.totalorder %s2315_s27, 2  ;;  %s1864_s22 = sand.u32 1, %s2303_s24  }
 0x276   : > { %s1865_s23 = scalar_lea.sflag [#allocation4], %s1864_s22 }
 0x277   : > { %p2211_p7 = pnand %p2214_p4, %p2402_p6 }
 0x279   : > { %p2212_p8 = pneg %p2211_p7 }
 0x27b   : > { %2298 = dma.done.wait (%p2212_p8), %s1865_s23, 1024  }
 0x27c   : > { %2300 = vsyncadd (%p2212_p8), %s1865_s23, 4294966272  ;;  %p17_p9 = scmp.ge.s32.totalorder %s2385_s30, 4   ;;  %s3537_s24 = smov %s2307_s25 }
 0x27d   : > { %s3538_s25 = smov %s2311_s26  ;;  %s3539_s26 = smov %s2396_s10 }
 0x27e   : > { %s3540_s27 = smov %s2385_s30  ;;  %19 = sbr.rel (!%p17_p9) target bundleno = 3 (0x3), region = 106 }
 0x283   :  { %1871 = vsyncpa [#allocation4], 1 }
 0x284   :  { %1873 = vsyncpa [#allocation4 + $0x1], 1 }

</bundles_post_ra>
